<compile_context>
chip_gen: v5e
topology: v5e:2x2
jax: 0.10.0
libtpu: 0.0.40
codegen_flags: <defaults>
</compile_context>

<pallas_src>
import functools

import jax
import jax.numpy as jnp
from jax.experimental import pallas as pl
from jax.experimental.pallas import tpu as pltpu

BIGNET_DIM = 128      # lane/MXU-friendly stand-in for the real BIGNET_DIM
N_TOKENS = 16         # batch rows for the demo
N_BLOCKS = 6
N_LINEAR = 3 * N_BLOCKS          # 18 HalfLinear layers total
N_LN = N_BLOCKS - 1              # 5 LayerNorms
LN_EPS = 1e-5
HALF = jnp.bfloat16


# --------------------------------------------------------------------------
# Fused kernel: Block, LN, Block, LN, ..., Block  (all in one body)
# --------------------------------------------------------------------------
def halfbignet_kernel(x_ref, w_ref, b_ref, g_ref, beta_ref, o_ref):
    """x_ref:   (tile_n, C) f32 activation tile
       w_ref:   (18, C, C)  bf16 weights, [in, out] layout (x @ W)
       b_ref:   (18, 1, C)  f32 biases (pre-cast at init; upcast is exact)
       g_ref:   (5, 1, C)   f32 LayerNorm gammas
       beta_ref:(5, 1, C)   f32 LayerNorm betas
       o_ref:   (tile_n, C) f32 output tile
    """
    x = x_ref[...].astype(jnp.float32)
    c = x_ref.shape[-1]
    inv_c = 1.0 / c

    for blk in range(N_BLOCKS):
        # ---- Block: Linear -> ReLU -> Linear -> ReLU -> Linear, + x ----
        h = x.astype(HALF)                      # x_half = x.to(float16)
        for layer in range(3):
            idx = blk * 3 + layer
            # bf16 matmul with f32 MXU accumulation, bias add in f32.
            y = jnp.dot(h, w_ref[idx], preferred_element_type=jnp.float32)
            y = y + b_ref[idx]
            if layer < 2:
                # Fused bias+ReLU in f32 before the half round:
                # bf16 round-to-nearest preserves sign and zero, so
                # round(relu(y)) == relu(round(y)) — identical to the module's
                # rounding points with one fewer bf16 elementwise pass.
                h = jnp.maximum(y, 0.0).astype(HALF)
            else:
                h = y.astype(HALF)              # out_half.to(x.dtype) rounding
        x = h.astype(jnp.float32) + x           # residual add in f32
        # NOTE: if large-tile bundle dumps show vld/vst saturation, stage the
        # f32 residual in an explicit VMEM scratch instead of registers.

        # ---- Full-precision LayerNorm (all blocks except the last) ----
        if blk < N_BLOCKS - 1:
            # Two independent lane reductions (dual-issue on the XLU) instead
            # of the serial mean -> subtract -> var chain.
            s1 = jnp.sum(x, axis=-1, keepdims=True)
            s2 = jnp.sum(x * x, axis=-1, keepdims=True)
            mean = s1 * inv_c
            var = jnp.maximum(s2 * inv_c - mean * mean, 0.0)  # clamp: cancellation
            inv = jax.lax.rsqrt(var + LN_EPS)
            x = (x - mean) * inv * g_ref[blk] + beta_ref[blk]

    o_ref[...] = x.astype(o_ref.dtype)


# --------------------------------------------------------------------------
# pallas_call wrapper: one launch for the entire network
# --------------------------------------------------------------------------
def half_bignet_forward(x, weights, biases, gammas, betas, *, tile_n=1024):
    N, C = x.shape
    tile_n = int(min(tile_n, N))
    # v7x has 2 TensorCores: if the whole batch would fit in one tile, split
    # it so the "parallel" grid axis actually shards across both cores.
    if N >= 16 and pl.cdiv(N, tile_n) < 2:
        tile_n = ((pl.cdiv(N, 2) + 7) // 8) * 8   # keep (8, 128) alignment
    grid = (pl.cdiv(N, tile_n),)

    row_spec = pl.BlockSpec((tile_n, C), lambda i: (i, 0))
    # Constant index_map: parameters are DMA'd into VMEM once and stay
    # resident across all row tiles (no re-fetch when the block index repeats).
    # (pipeline_mode=pl.Buffered(1) would drop their redundant double buffer
    #  — only worth it when tile_n is pushed against the scoped-VMEM limit.)
    w_spec = pl.BlockSpec(weights.shape, lambda i: (0, 0, 0))
    b_spec = pl.BlockSpec(biases.shape, lambda i: (0, 0, 0))
    g_spec = pl.BlockSpec(gammas.shape, lambda i: (0, 0, 0))
    beta_spec = pl.BlockSpec(betas.shape, lambda i: (0, 0, 0))

    # Scoped-VMEM budget: params (double-buffered by default) + in/out row
    # tiles (double-buffered) + in-body f32 temporaries, with headroom.
    # Floor at 32 MiB (raises v5e's 16 MiB default), cap at v7x's 64 MiB
    # physical VMEM so a v6e-tuned tile cannot silently overshoot on v7x.
    param_bytes = (weights.size * weights.dtype.itemsize
                   + biases.size * biases.dtype.itemsize
                   + gammas.size * gammas.dtype.itemsize
                   + betas.size * betas.dtype.itemsize)
    act_bytes = tile_n * C * 4
    vmem_bytes = 2 * param_bytes + 4 * act_bytes + 6 * act_bytes + (2 << 20)
    vmem_limit = int(min(max(vmem_bytes, 32 << 20), 64 << 20))

    return pl.pallas_call(
        halfbignet_kernel,
        out_shape=jax.ShapeDtypeStruct((N, C), x.dtype),
        grid=grid,
        in_specs=[row_spec, w_spec, b_spec, g_spec, beta_spec],
        out_specs=row_spec,
        compiler_params=pltpu.CompilerParams(
            dimension_semantics=("parallel",),   # row tiles shard across TCs
            vmem_limit_bytes=vmem_limit,
        ),
    )(x, weights, biases, gammas, betas)


half_bignet_forward_jit = jax.jit(
    functools.partial(half_bignet_forward, tile_n=1024)
)


# --------------------------------------------------------------------------
# Deterministic parameter init (mirrors torch.nn.Linear default init, then
# .half(); biases are the bf16 values exactly upcast to f32 once at init)
# --------------------------------------------------------------------------
def init_params(key, dim=BIGNET_DIM, n_blocks=N_BLOCKS):
    bound = 1.0 / (dim ** 0.5)
    ws, bs = [], []
    for _ in range(3 * n_blocks):
        key, kw, kb = jax.random.split(key, 3)
        # torch weight is [out, in]; pre-transpose to [in, out] so the kernel
        # computes x @ W directly (uniform init is symmetric, semantics equal).
        ws.append(jax.random.uniform(kw, (dim, dim), jnp.float32,
                                     -bound, bound).astype(HALF))
        b_half = jax.random.uniform(kb, (1, dim), jnp.float32,
                                    -bound, bound).astype(HALF)
        bs.append(b_half.astype(jnp.float32))    # exact upcast of the half param
    weights = jnp.stack(ws)                               # (18, dim, dim) bf16
    biases = jnp.stack(bs)                                # (18, 1, dim)  f32
    gammas = jnp.ones((n_blocks - 1, 1, dim), jnp.float32)   # LN weight = 1
    betas = jnp.zeros((n_blocks - 1, 1, dim), jnp.float32)   # LN bias   = 0
    return weights, biases, gammas, betas


# --------------------------------------------------------------------------
# Pure-JAX reference (same rounding points, torch-style two-pass LN)
# --------------------------------------------------------------------------
def reference_forward(x, weights, biases, gammas, betas):
    y = x.astype(jnp.float32)
    for blk in range(N_BLOCKS):
        h = y.astype(HALF)
        for layer in range(3):
            idx = blk * 3 + layer
            z = jnp.dot(h, weights[idx], preferred_element_type=jnp.float32)
            z = (z + biases[idx]).astype(HALF)
            h = jnp.maximum(z, 0.0) if layer < 2 else z
        y = h.astype(jnp.float32) + y
        if blk < N_BLOCKS - 1:
            mean = jnp.mean(y, axis=-1, keepdims=True)
            yc = y - mean
            var = jnp.mean(yc * yc, axis=-1, keepdims=True)
            y = yc * jax.lax.rsqrt(var + LN_EPS) * gammas[blk] + betas[blk]
    return y


if __name__ == "__main__":
    key = jax.random.PRNGKey(0)
    key, kx, kp = jax.random.split(key, 3)
    x = jax.random.normal(kx, (N_TOKENS, BIGNET_DIM), dtype=jnp.float32)
    weights, biases, gammas, betas = init_params(kp, BIGNET_DIM)

    out = half_bignet_forward_jit(x, weights, biases, gammas, betas)
    jax.block_until_ready(out)

    assert out.shape == (N_TOKENS, BIGNET_DIM) and out.dtype == jnp.float32
    assert bool(jnp.all(jnp.isfinite(out)))

    ref = reference_forward(x, weights, biases, gammas, betas)
    assert bool(jnp.allclose(out, ref, atol=1e-1, rtol=1e-2)), (
        float(jnp.max(jnp.abs(out - ref)))
    )

    print("KERNEL_OK")
</pallas_src>

<mosaic_0001>
module attributes {stable_mosaic.version = 11 : i64} {
  func.func @halfbignet_kernel(%arg0: i32, %arg1: memref<8x128xf32, #tpu.memory_space<vmem>>, %arg2: memref<18x128x128xbf16, #tpu.memory_space<vmem>>, %arg3: memref<18x1x128xf32, #tpu.memory_space<vmem>>, %arg4: memref<5x1x128xf32, #tpu.memory_space<vmem>>, %arg5: memref<5x1x128xf32, #tpu.memory_space<vmem>>, %arg6: memref<8x128xf32, #tpu.memory_space<vmem>>) attributes {dimension_semantics = [#tpu.dimension_semantics<parallel>], iteration_bounds = array<i64: 2>, scalar_prefetch = 0 : i64, scratch_operands = 0 : i64, tpu.core_type = #tpu.core_type<tc>, window_params = [{transform_indices = @transform_0, window_bounds = array<i64: 8, 128>}, {pipeline_mode = #tpu.pipeline_mode<synchronous>, transform_indices = @transform_1, window_bounds = array<i64: 18, 128, 128>}, {pipeline_mode = #tpu.pipeline_mode<synchronous>, transform_indices = @transform_2, window_bounds = array<i64: 18, 1, 128>}, {pipeline_mode = #tpu.pipeline_mode<synchronous>, transform_indices = @transform_3, window_bounds = array<i64: 5, 1, 128>}, {pipeline_mode = #tpu.pipeline_mode<synchronous>, transform_indices = @transform_4, window_bounds = array<i64: 5, 1, 128>}, {transform_indices = @transform_5, window_bounds = array<i64: 8, 128>}]} {
    %c0 = arith.constant 0 : index
    %c0_0 = arith.constant 0 : index
    %0 = vector.load %arg1[%c0, %c0_0] : memref<8x128xf32, #tpu.memory_space<vmem>>, vector<8x128xf32>
    %1 = arith.truncf %0 : vector<8x128xf32> to vector<8x128xbf16>
    %c0_1 = arith.constant 0 : index
    %c0_2 = arith.constant 0 : index
    %c0_3 = arith.constant 0 : index
    %2 = vector.load %arg2[%c0_1, %c0_2, %c0_3] : memref<18x128x128xbf16, #tpu.memory_space<vmem>>, vector<1x128x128xbf16>
    %3 = vector.shape_cast %2 : vector<1x128x128xbf16> to vector<128x128xbf16>
    %cst = arith.constant dense<0.000000e+00> : vector<8x128xf32>
    %4 = tpu.matmul %1, %3, %cst {dimension_numbers = #tpu.dot_dimension_numbers<[1], [0], [0], [1], [0, 0, 1, 1], [], []>} : vector<8x128xbf16>, vector<128x128xbf16>, vector<8x128xf32> -> vector<8x128xf32>
    %c0_4 = arith.constant 0 : index
    %c0_5 = arith.constant 0 : index
    %c0_6 = arith.constant 0 : index
    %5 = vector.load %arg3[%c0_4, %c0_5, %c0_6] : memref<18x1x128xf32, #tpu.memory_space<vmem>>, vector<1x1x128xf32>
    %6 = vector.shape_cast %5 : vector<1x1x128xf32> to vector<1x128xf32>
    %7 = vector.broadcast %6 : vector<1x128xf32> to vector<8x128xf32>
    %8 = arith.addf %4, %7 : vector<8x128xf32>
    %cst_7 = arith.constant 0.000000e+00 : f32
    %9 = vector.broadcast %cst_7 : f32 to vector<8x128xf32>
    %10 = arith.maximumf %8, %9 : vector<8x128xf32>
    %11 = arith.truncf %10 : vector<8x128xf32> to vector<8x128xbf16>
    %c1 = arith.constant 1 : index
    %c0_8 = arith.constant 0 : index
    %c0_9 = arith.constant 0 : index
    %12 = vector.load %arg2[%c1, %c0_8, %c0_9] : memref<18x128x128xbf16, #tpu.memory_space<vmem>>, vector<1x128x128xbf16>
    %13 = vector.shape_cast %12 : vector<1x128x128xbf16> to vector<128x128xbf16>
    %cst_10 = arith.constant dense<0.000000e+00> : vector<8x128xf32>
    %14 = tpu.matmul %11, %13, %cst_10 {dimension_numbers = #tpu.dot_dimension_numbers<[1], [0], [0], [1], [0, 0, 1, 1], [], []>} : vector<8x128xbf16>, vector<128x128xbf16>, vector<8x128xf32> -> vector<8x128xf32>
    %c1_11 = arith.constant 1 : index
    %c0_12 = arith.constant 0 : index
    %c0_13 = arith.constant 0 : index
    %15 = vector.load %arg3[%c1_11, %c0_12, %c0_13] : memref<18x1x128xf32, #tpu.memory_space<vmem>>, vector<1x1x128xf32>
    %16 = vector.shape_cast %15 : vector<1x1x128xf32> to vector<1x128xf32>
    %17 = vector.broadcast %16 : vector<1x128xf32> to vector<8x128xf32>
    %18 = arith.addf %14, %17 : vector<8x128xf32>
    %cst_14 = arith.constant 0.000000e+00 : f32
    %19 = vector.broadcast %cst_14 : f32 to vector<8x128xf32>
    %20 = arith.maximumf %18, %19 : vector<8x128xf32>
    %21 = arith.truncf %20 : vector<8x128xf32> to vector<8x128xbf16>
    %c2 = arith.constant 2 : index
    %c0_15 = arith.constant 0 : index
    %c0_16 = arith.constant 0 : index
    %22 = vector.load %arg2[%c2, %c0_15, %c0_16] : memref<18x128x128xbf16, #tpu.memory_space<vmem>>, vector<1x128x128xbf16>
    %23 = vector.shape_cast %22 : vector<1x128x128xbf16> to vector<128x128xbf16>
    %cst_17 = arith.constant dense<0.000000e+00> : vector<8x128xf32>
    %24 = tpu.matmul %21, %23, %cst_17 {dimension_numbers = #tpu.dot_dimension_numbers<[1], [0], [0], [1], [0, 0, 1, 1], [], []>} : vector<8x128xbf16>, vector<128x128xbf16>, vector<8x128xf32> -> vector<8x128xf32>
    %c2_18 = arith.constant 2 : index
    %c0_19 = arith.constant 0 : index
    %c0_20 = arith.constant 0 : index
    %25 = vector.load %arg3[%c2_18, %c0_19, %c0_20] : memref<18x1x128xf32, #tpu.memory_space<vmem>>, vector<1x1x128xf32>
    %26 = vector.shape_cast %25 : vector<1x1x128xf32> to vector<1x128xf32>
    %27 = vector.broadcast %26 : vector<1x128xf32> to vector<8x128xf32>
    %28 = arith.addf %24, %27 : vector<8x128xf32>
    %29 = arith.truncf %28 : vector<8x128xf32> to vector<8x128xbf16>
    %30 = arith.extf %29 : vector<8x128xbf16> to vector<8x128xf32>
    %31 = arith.addf %30, %0 : vector<8x128xf32>
    %cst_21 = arith.constant dense<0.000000e+00> : vector<8xf32>
    %32 = vector.multi_reduction <add>, %31, %cst_21 [1] : vector<8x128xf32> to vector<8xf32>
    %33 = vector.shape_cast %32 : vector<8xf32> to vector<8x1xf32>
    %34 = arith.mulf %31, %31 : vector<8x128xf32>
    %cst_22 = arith.constant dense<0.000000e+00> : vector<8xf32>
    %35 = vector.multi_reduction <add>, %34, %cst_22 [1] : vector<8x128xf32> to vector<8xf32>
    %36 = vector.shape_cast %35 : vector<8xf32> to vector<8x1xf32>
    %cst_23 = arith.constant 7.812500e-03 : f32
    %37 = vector.broadcast %cst_23 : f32 to vector<8x1xf32>
    %38 = arith.mulf %33, %37 : vector<8x1xf32>
    %cst_24 = arith.constant 7.812500e-03 : f32
    %39 = vector.broadcast %cst_24 : f32 to vector<8x1xf32>
    %40 = arith.mulf %36, %39 : vector<8x1xf32>
    %41 = arith.mulf %38, %38 : vector<8x1xf32>
    %42 = arith.subf %40, %41 : vector<8x1xf32>
    %cst_25 = arith.constant 0.000000e+00 : f32
    %43 = vector.broadcast %cst_25 : f32 to vector<8x1xf32>
    %44 = arith.maximumf %42, %43 : vector<8x1xf32>
    %cst_26 = arith.constant 9.99999974E-6 : f32
    %45 = vector.broadcast %cst_26 : f32 to vector<8x1xf32>
    %46 = arith.addf %44, %45 : vector<8x1xf32>
    %47 = math.rsqrt %46 : vector<8x1xf32>
    %48 = vector.broadcast %38 : vector<8x1xf32> to vector<8x128xf32>
    %49 = arith.subf %31, %48 : vector<8x128xf32>
    %50 = vector.broadcast %47 : vector<8x1xf32> to vector<8x128xf32>
    %51 = arith.mulf %49, %50 : vector<8x128xf32>
    %c0_27 = arith.constant 0 : index
    %c0_28 = arith.constant 0 : index
    %c0_29 = arith.constant 0 : index
    %52 = vector.load %arg4[%c0_27, %c0_28, %c0_29] : memref<5x1x128xf32, #tpu.memory_space<vmem>>, vector<1x1x128xf32>
    %53 = vector.shape_cast %52 : vector<1x1x128xf32> to vector<1x128xf32>
    %54 = vector.broadcast %53 : vector<1x128xf32> to vector<8x128xf32>
    %55 = arith.mulf %51, %54 : vector<8x128xf32>
    %c0_30 = arith.constant 0 : index
    %c0_31 = arith.constant 0 : index
    %c0_32 = arith.constant 0 : index
    %56 = vector.load %arg5[%c0_30, %c0_31, %c0_32] : memref<5x1x128xf32, #tpu.memory_space<vmem>>, vector<1x1x128xf32>
    %57 = vector.shape_cast %56 : vector<1x1x128xf32> to vector<1x128xf32>
    %58 = vector.broadcast %57 : vector<1x128xf32> to vector<8x128xf32>
    %59 = arith.addf %55, %58 : vector<8x128xf32>
    %60 = arith.truncf %59 : vector<8x128xf32> to vector<8x128xbf16>
    %c3 = arith.constant 3 : index
    %c0_33 = arith.constant 0 : index
    %c0_34 = arith.constant 0 : index
    %61 = vector.load %arg2[%c3, %c0_33, %c0_34] : memref<18x128x128xbf16, #tpu.memory_space<vmem>>, vector<1x128x128xbf16>
    %62 = vector.shape_cast %61 : vector<1x128x128xbf16> to vector<128x128xbf16>
    %cst_35 = arith.constant dense<0.000000e+00> : vector<8x128xf32>
    %63 = tpu.matmul %60, %62, %cst_35 {dimension_numbers = #tpu.dot_dimension_numbers<[1], [0], [0], [1], [0, 0, 1, 1], [], []>} : vector<8x128xbf16>, vector<128x128xbf16>, vector<8x128xf32> -> vector<8x128xf32>
    %c3_36 = arith.constant 3 : index
    %c0_37 = arith.constant 0 : index
    %c0_38 = arith.constant 0 : index
    %64 = vector.load %arg3[%c3_36, %c0_37, %c0_38] : memref<18x1x128xf32, #tpu.memory_space<vmem>>, vector<1x1x128xf32>
    %65 = vector.shape_cast %64 : vector<1x1x128xf32> to vector<1x128xf32>
    %66 = vector.broadcast %65 : vector<1x128xf32> to vector<8x128xf32>
    %67 = arith.addf %63, %66 : vector<8x128xf32>
    %cst_39 = arith.constant 0.000000e+00 : f32
    %68 = vector.broadcast %cst_39 : f32 to vector<8x128xf32>
    %69 = arith.maximumf %67, %68 : vector<8x128xf32>
    %70 = arith.truncf %69 : vector<8x128xf32> to vector<8x128xbf16>
    %c4 = arith.constant 4 : index
    %c0_40 = arith.constant 0 : index
    %c0_41 = arith.constant 0 : index
    %71 = vector.load %arg2[%c4, %c0_40, %c0_41] : memref<18x128x128xbf16, #tpu.memory_space<vmem>>, vector<1x128x128xbf16>
    %72 = vector.shape_cast %71 : vector<1x128x128xbf16> to vector<128x128xbf16>
    %cst_42 = arith.constant dense<0.000000e+00> : vector<8x128xf32>
    %73 = tpu.matmul %70, %72, %cst_42 {dimension_numbers = #tpu.dot_dimension_numbers<[1], [0], [0], [1], [0, 0, 1, 1], [], []>} : vector<8x128xbf16>, vector<128x128xbf16>, vector<8x128xf32> -> vector<8x128xf32>
    %c4_43 = arith.constant 4 : index
    %c0_44 = arith.constant 0 : index
    %c0_45 = arith.constant 0 : index
    %74 = vector.load %arg3[%c4_43, %c0_44, %c0_45] : memref<18x1x128xf32, #tpu.memory_space<vmem>>, vector<1x1x128xf32>
    %75 = vector.shape_cast %74 : vector<1x1x128xf32> to vector<1x128xf32>
    %76 = vector.broadcast %75 : vector<1x128xf32> to vector<8x128xf32>
    %77 = arith.addf %73, %76 : vector<8x128xf32>
    %cst_46 = arith.constant 0.000000e+00 : f32
    %78 = vector.broadcast %cst_46 : f32 to vector<8x128xf32>
    %79 = arith.maximumf %77, %78 : vector<8x128xf32>
    %80 = arith.truncf %79 : vector<8x128xf32> to vector<8x128xbf16>
    %c5 = arith.constant 5 : index
    %c0_47 = arith.constant 0 : index
    %c0_48 = arith.constant 0 : index
    %81 = vector.load %arg2[%c5, %c0_47, %c0_48] : memref<18x128x128xbf16, #tpu.memory_space<vmem>>, vector<1x128x128xbf16>
    %82 = vector.shape_cast %81 : vector<1x128x128xbf16> to vector<128x128xbf16>
    %cst_49 = arith.constant dense<0.000000e+00> : vector<8x128xf32>
    %83 = tpu.matmul %80, %82, %cst_49 {dimension_numbers = #tpu.dot_dimension_numbers<[1], [0], [0], [1], [0, 0, 1, 1], [], []>} : vector<8x128xbf16>, vector<128x128xbf16>, vector<8x128xf32> -> vector<8x128xf32>
    %c5_50 = arith.constant 5 : index
    %c0_51 = arith.constant 0 : index
    %c0_52 = arith.constant 0 : index
    %84 = vector.load %arg3[%c5_50, %c0_51, %c0_52] : memref<18x1x128xf32, #tpu.memory_space<vmem>>, vector<1x1x128xf32>
    %85 = vector.shape_cast %84 : vector<1x1x128xf32> to vector<1x128xf32>
    %86 = vector.broadcast %85 : vector<1x128xf32> to vector<8x128xf32>
    %87 = arith.addf %83, %86 : vector<8x128xf32>
    %88 = arith.truncf %87 : vector<8x128xf32> to vector<8x128xbf16>
    %89 = arith.extf %88 : vector<8x128xbf16> to vector<8x128xf32>
    %90 = arith.addf %89, %59 : vector<8x128xf32>
    %cst_53 = arith.constant dense<0.000000e+00> : vector<8xf32>
    %91 = vector.multi_reduction <add>, %90, %cst_53 [1] : vector<8x128xf32> to vector<8xf32>
    %92 = vector.shape_cast %91 : vector<8xf32> to vector<8x1xf32>
    %93 = arith.mulf %90, %90 : vector<8x128xf32>
    %cst_54 = arith.constant dense<0.000000e+00> : vector<8xf32>
    %94 = vector.multi_reduction <add>, %93, %cst_54 [1] : vector<8x128xf32> to vector<8xf32>
    %95 = vector.shape_cast %94 : vector<8xf32> to vector<8x1xf32>
    %cst_55 = arith.constant 7.812500e-03 : f32
    %96 = vector.broadcast %cst_55 : f32 to vector<8x1xf32>
    %97 = arith.mulf %92, %96 : vector<8x1xf32>
    %cst_56 = arith.constant 7.812500e-03 : f32
    %98 = vector.broadcast %cst_56 : f32 to vector<8x1xf32>
    %99 = arith.mulf %95, %98 : vector<8x1xf32>
    %100 = arith.mulf %97, %97 : vector<8x1xf32>
    %101 = arith.subf %99, %100 : vector<8x1xf32>
    %cst_57 = arith.constant 0.000000e+00 : f32
    %102 = vector.broadcast %cst_57 : f32 to vector<8x1xf32>
    %103 = arith.maximumf %101, %102 : vector<8x1xf32>
    %cst_58 = arith.constant 9.99999974E-6 : f32
    %104 = vector.broadcast %cst_58 : f32 to vector<8x1xf32>
    %105 = arith.addf %103, %104 : vector<8x1xf32>
    %106 = math.rsqrt %105 : vector<8x1xf32>
    %107 = vector.broadcast %97 : vector<8x1xf32> to vector<8x128xf32>
    %108 = arith.subf %90, %107 : vector<8x128xf32>
    %109 = vector.broadcast %106 : vector<8x1xf32> to vector<8x128xf32>
    %110 = arith.mulf %108, %109 : vector<8x128xf32>
    %c1_59 = arith.constant 1 : index
    %c0_60 = arith.constant 0 : index
    %c0_61 = arith.constant 0 : index
    %111 = vector.load %arg4[%c1_59, %c0_60, %c0_61] : memref<5x1x128xf32, #tpu.memory_space<vmem>>, vector<1x1x128xf32>
    %112 = vector.shape_cast %111 : vector<1x1x128xf32> to vector<1x128xf32>
    %113 = vector.broadcast %112 : vector<1x128xf32> to vector<8x128xf32>
    %114 = arith.mulf %110, %113 : vector<8x128xf32>
    %c1_62 = arith.constant 1 : index
    %c0_63 = arith.constant 0 : index
    %c0_64 = arith.constant 0 : index
    %115 = vector.load %arg5[%c1_62, %c0_63, %c0_64] : memref<5x1x128xf32, #tpu.memory_space<vmem>>, vector<1x1x128xf32>
    %116 = vector.shape_cast %115 : vector<1x1x128xf32> to vector<1x128xf32>
    %117 = vector.broadcast %116 : vector<1x128xf32> to vector<8x128xf32>
    %118 = arith.addf %114, %117 : vector<8x128xf32>
    %119 = arith.truncf %118 : vector<8x128xf32> to vector<8x128xbf16>
    %c6 = arith.constant 6 : index
    %c0_65 = arith.constant 0 : index
    %c0_66 = arith.constant 0 : index
    %120 = vector.load %arg2[%c6, %c0_65, %c0_66] : memref<18x128x128xbf16, #tpu.memory_space<vmem>>, vector<1x128x128xbf16>
    %121 = vector.shape_cast %120 : vector<1x128x128xbf16> to vector<128x128xbf16>
    %cst_67 = arith.constant dense<0.000000e+00> : vector<8x128xf32>
    %122 = tpu.matmul %119, %121, %cst_67 {dimension_numbers = #tpu.dot_dimension_numbers<[1], [0], [0], [1], [0, 0, 1, 1], [], []>} : vector<8x128xbf16>, vector<128x128xbf16>, vector<8x128xf32> -> vector<8x128xf32>
    %c6_68 = arith.constant 6 : index
    %c0_69 = arith.constant 0 : index
    %c0_70 = arith.constant 0 : index
    %123 = vector.load %arg3[%c6_68, %c0_69, %c0_70] : memref<18x1x128xf32, #tpu.memory_space<vmem>>, vector<1x1x128xf32>
    %124 = vector.shape_cast %123 : vector<1x1x128xf32> to vector<1x128xf32>
    %125 = vector.broadcast %124 : vector<1x128xf32> to vector<8x128xf32>
    %126 = arith.addf %122, %125 : vector<8x128xf32>
    %cst_71 = arith.constant 0.000000e+00 : f32
    %127 = vector.broadcast %cst_71 : f32 to vector<8x128xf32>
    %128 = arith.maximumf %126, %127 : vector<8x128xf32>
    %129 = arith.truncf %128 : vector<8x128xf32> to vector<8x128xbf16>
    %c7 = arith.constant 7 : index
    %c0_72 = arith.constant 0 : index
    %c0_73 = arith.constant 0 : index
    %130 = vector.load %arg2[%c7, %c0_72, %c0_73] : memref<18x128x128xbf16, #tpu.memory_space<vmem>>, vector<1x128x128xbf16>
    %131 = vector.shape_cast %130 : vector<1x128x128xbf16> to vector<128x128xbf16>
    %cst_74 = arith.constant dense<0.000000e+00> : vector<8x128xf32>
    %132 = tpu.matmul %129, %131, %cst_74 {dimension_numbers = #tpu.dot_dimension_numbers<[1], [0], [0], [1], [0, 0, 1, 1], [], []>} : vector<8x128xbf16>, vector<128x128xbf16>, vector<8x128xf32> -> vector<8x128xf32>
    %c7_75 = arith.constant 7 : index
    %c0_76 = arith.constant 0 : index
    %c0_77 = arith.constant 0 : index
    %133 = vector.load %arg3[%c7_75, %c0_76, %c0_77] : memref<18x1x128xf32, #tpu.memory_space<vmem>>, vector<1x1x128xf32>
    %134 = vector.shape_cast %133 : vector<1x1x128xf32> to vector<1x128xf32>
    %135 = vector.broadcast %134 : vector<1x128xf32> to vector<8x128xf32>
    %136 = arith.addf %132, %135 : vector<8x128xf32>
    %cst_78 = arith.constant 0.000000e+00 : f32
    %137 = vector.broadcast %cst_78 : f32 to vector<8x128xf32>
    %138 = arith.maximumf %136, %137 : vector<8x128xf32>
    %139 = arith.truncf %138 : vector<8x128xf32> to vector<8x128xbf16>
    %c8 = arith.constant 8 : index
    %c0_79 = arith.constant 0 : index
    %c0_80 = arith.constant 0 : index
    %140 = vector.load %arg2[%c8, %c0_79, %c0_80] : memref<18x128x128xbf16, #tpu.memory_space<vmem>>, vector<1x128x128xbf16>
    %141 = vector.shape_cast %140 : vector<1x128x128xbf16> to vector<128x128xbf16>
    %cst_81 = arith.constant dense<0.000000e+00> : vector<8x128xf32>
    %142 = tpu.matmul %139, %141, %cst_81 {dimension_numbers = #tpu.dot_dimension_numbers<[1], [0], [0], [1], [0, 0, 1, 1], [], []>} : vector<8x128xbf16>, vector<128x128xbf16>, vector<8x128xf32> -> vector<8x128xf32>
    %c8_82 = arith.constant 8 : index
    %c0_83 = arith.constant 0 : index
    %c0_84 = arith.constant 0 : index
    %143 = vector.load %arg3[%c8_82, %c0_83, %c0_84] : memref<18x1x128xf32, #tpu.memory_space<vmem>>, vector<1x1x128xf32>
    %144 = vector.shape_cast %143 : vector<1x1x128xf32> to vector<1x128xf32>
    %145 = vector.broadcast %144 : vector<1x128xf32> to vector<8x128xf32>
    %146 = arith.addf %142, %145 : vector<8x128xf32>
    %147 = arith.truncf %146 : vector<8x128xf32> to vector<8x128xbf16>
    %148 = arith.extf %147 : vector<8x128xbf16> to vector<8x128xf32>
    %149 = arith.addf %148, %118 : vector<8x128xf32>
    %cst_85 = arith.constant dense<0.000000e+00> : vector<8xf32>
    %150 = vector.multi_reduction <add>, %149, %cst_85 [1] : vector<8x128xf32> to vector<8xf32>
    %151 = vector.shape_cast %150 : vector<8xf32> to vector<8x1xf32>
    %152 = arith.mulf %149, %149 : vector<8x128xf32>
    %cst_86 = arith.constant dense<0.000000e+00> : vector<8xf32>
    %153 = vector.multi_reduction <add>, %152, %cst_86 [1] : vector<8x128xf32> to vector<8xf32>
    %154 = vector.shape_cast %153 : vector<8xf32> to vector<8x1xf32>
    %cst_87 = arith.constant 7.812500e-03 : f32
    %155 = vector.broadcast %cst_87 : f32 to vector<8x1xf32>
    %156 = arith.mulf %151, %155 : vector<8x1xf32>
    %cst_88 = arith.constant 7.812500e-03 : f32
    %157 = vector.broadcast %cst_88 : f32 to vector<8x1xf32>
    %158 = arith.mulf %154, %157 : vector<8x1xf32>
    %159 = arith.mulf %156, %156 : vector<8x1xf32>
    %160 = arith.subf %158, %159 : vector<8x1xf32>
    %cst_89 = arith.constant 0.000000e+00 : f32
    %161 = vector.broadcast %cst_89 : f32 to vector<8x1xf32>
    %162 = arith.maximumf %160, %161 : vector<8x1xf32>
    %cst_90 = arith.constant 9.99999974E-6 : f32
    %163 = vector.broadcast %cst_90 : f32 to vector<8x1xf32>
    %164 = arith.addf %162, %163 : vector<8x1xf32>
    %165 = math.rsqrt %164 : vector<8x1xf32>
    %166 = vector.broadcast %156 : vector<8x1xf32> to vector<8x128xf32>
    %167 = arith.subf %149, %166 : vector<8x128xf32>
    %168 = vector.broadcast %165 : vector<8x1xf32> to vector<8x128xf32>
    %169 = arith.mulf %167, %168 : vector<8x128xf32>
    %c2_91 = arith.constant 2 : index
    %c0_92 = arith.constant 0 : index
    %c0_93 = arith.constant 0 : index
    %170 = vector.load %arg4[%c2_91, %c0_92, %c0_93] : memref<5x1x128xf32, #tpu.memory_space<vmem>>, vector<1x1x128xf32>
    %171 = vector.shape_cast %170 : vector<1x1x128xf32> to vector<1x128xf32>
    %172 = vector.broadcast %171 : vector<1x128xf32> to vector<8x128xf32>
    %173 = arith.mulf %169, %172 : vector<8x128xf32>
    %c2_94 = arith.constant 2 : index
    %c0_95 = arith.constant 0 : index
    %c0_96 = arith.constant 0 : index
    %174 = vector.load %arg5[%c2_94, %c0_95, %c0_96] : memref<5x1x128xf32, #tpu.memory_space<vmem>>, vector<1x1x128xf32>
    %175 = vector.shape_cast %174 : vector<1x1x128xf32> to vector<1x128xf32>
    %176 = vector.broadcast %175 : vector<1x128xf32> to vector<8x128xf32>
    %177 = arith.addf %173, %176 : vector<8x128xf32>
    %178 = arith.truncf %177 : vector<8x128xf32> to vector<8x128xbf16>
    %c9 = arith.constant 9 : index
    %c0_97 = arith.constant 0 : index
    %c0_98 = arith.constant 0 : index
    %179 = vector.load %arg2[%c9, %c0_97, %c0_98] : memref<18x128x128xbf16, #tpu.memory_space<vmem>>, vector<1x128x128xbf16>
    %180 = vector.shape_cast %179 : vector<1x128x128xbf16> to vector<128x128xbf16>
    %cst_99 = arith.constant dense<0.000000e+00> : vector<8x128xf32>
    %181 = tpu.matmul %178, %180, %cst_99 {dimension_numbers = #tpu.dot_dimension_numbers<[1], [0], [0], [1], [0, 0, 1, 1], [], []>} : vector<8x128xbf16>, vector<128x128xbf16>, vector<8x128xf32> -> vector<8x128xf32>
    %c9_100 = arith.constant 9 : index
    %c0_101 = arith.constant 0 : index
    %c0_102 = arith.constant 0 : index
    %182 = vector.load %arg3[%c9_100, %c0_101, %c0_102] : memref<18x1x128xf32, #tpu.memory_space<vmem>>, vector<1x1x128xf32>
    %183 = vector.shape_cast %182 : vector<1x1x128xf32> to vector<1x128xf32>
    %184 = vector.broadcast %183 : vector<1x128xf32> to vector<8x128xf32>
    %185 = arith.addf %181, %184 : vector<8x128xf32>
    %cst_103 = arith.constant 0.000000e+00 : f32
    %186 = vector.broadcast %cst_103 : f32 to vector<8x128xf32>
    %187 = arith.maximumf %185, %186 : vector<8x128xf32>
    %188 = arith.truncf %187 : vector<8x128xf32> to vector<8x128xbf16>
    %c10 = arith.constant 10 : index
    %c0_104 = arith.constant 0 : index
    %c0_105 = arith.constant 0 : index
    %189 = vector.load %arg2[%c10, %c0_104, %c0_105] : memref<18x128x128xbf16, #tpu.memory_space<vmem>>, vector<1x128x128xbf16>
    %190 = vector.shape_cast %189 : vector<1x128x128xbf16> to vector<128x128xbf16>
    %cst_106 = arith.constant dense<0.000000e+00> : vector<8x128xf32>
    %191 = tpu.matmul %188, %190, %cst_106 {dimension_numbers = #tpu.dot_dimension_numbers<[1], [0], [0], [1], [0, 0, 1, 1], [], []>} : vector<8x128xbf16>, vector<128x128xbf16>, vector<8x128xf32> -> vector<8x128xf32>
    %c10_107 = arith.constant 10 : index
    %c0_108 = arith.constant 0 : index
    %c0_109 = arith.constant 0 : index
    %192 = vector.load %arg3[%c10_107, %c0_108, %c0_109] : memref<18x1x128xf32, #tpu.memory_space<vmem>>, vector<1x1x128xf32>
    %193 = vector.shape_cast %192 : vector<1x1x128xf32> to vector<1x128xf32>
    %194 = vector.broadcast %193 : vector<1x128xf32> to vector<8x128xf32>
    %195 = arith.addf %191, %194 : vector<8x128xf32>
    %cst_110 = arith.constant 0.000000e+00 : f32
    %196 = vector.broadcast %cst_110 : f32 to vector<8x128xf32>
    %197 = arith.maximumf %195, %196 : vector<8x128xf32>
    %198 = arith.truncf %197 : vector<8x128xf32> to vector<8x128xbf16>
    %c11 = arith.constant 11 : index
    %c0_111 = arith.constant 0 : index
    %c0_112 = arith.constant 0 : index
    %199 = vector.load %arg2[%c11, %c0_111, %c0_112] : memref<18x128x128xbf16, #tpu.memory_space<vmem>>, vector<1x128x128xbf16>
    %200 = vector.shape_cast %199 : vector<1x128x128xbf16> to vector<128x128xbf16>
    %cst_113 = arith.constant dense<0.000000e+00> : vector<8x128xf32>
    %201 = tpu.matmul %198, %200, %cst_113 {dimension_numbers = #tpu.dot_dimension_numbers<[1], [0], [0], [1], [0, 0, 1, 1], [], []>} : vector<8x128xbf16>, vector<128x128xbf16>, vector<8x128xf32> -> vector<8x128xf32>
    %c11_114 = arith.constant 11 : index
    %c0_115 = arith.constant 0 : index
    %c0_116 = arith.constant 0 : index
    %202 = vector.load %arg3[%c11_114, %c0_115, %c0_116] : memref<18x1x128xf32, #tpu.memory_space<vmem>>, vector<1x1x128xf32>
    %203 = vector.shape_cast %202 : vector<1x1x128xf32> to vector<1x128xf32>
    %204 = vector.broadcast %203 : vector<1x128xf32> to vector<8x128xf32>
    %205 = arith.addf %201, %204 : vector<8x128xf32>
    %206 = arith.truncf %205 : vector<8x128xf32> to vector<8x128xbf16>
    %207 = arith.extf %206 : vector<8x128xbf16> to vector<8x128xf32>
    %208 = arith.addf %207, %177 : vector<8x128xf32>
    %cst_117 = arith.constant dense<0.000000e+00> : vector<8xf32>
    %209 = vector.multi_reduction <add>, %208, %cst_117 [1] : vector<8x128xf32> to vector<8xf32>
    %210 = vector.shape_cast %209 : vector<8xf32> to vector<8x1xf32>
    %211 = arith.mulf %208, %208 : vector<8x128xf32>
    %cst_118 = arith.constant dense<0.000000e+00> : vector<8xf32>
    %212 = vector.multi_reduction <add>, %211, %cst_118 [1] : vector<8x128xf32> to vector<8xf32>
    %213 = vector.shape_cast %212 : vector<8xf32> to vector<8x1xf32>
    %cst_119 = arith.constant 7.812500e-03 : f32
    %214 = vector.broadcast %cst_119 : f32 to vector<8x1xf32>
    %215 = arith.mulf %210, %214 : vector<8x1xf32>
    %cst_120 = arith.constant 7.812500e-03 : f32
    %216 = vector.broadcast %cst_120 : f32 to vector<8x1xf32>
    %217 = arith.mulf %213, %216 : vector<8x1xf32>
    %218 = arith.mulf %215, %215 : vector<8x1xf32>
    %219 = arith.subf %217, %218 : vector<8x1xf32>
    %cst_121 = arith.constant 0.000000e+00 : f32
    %220 = vector.broadcast %cst_121 : f32 to vector<8x1xf32>
    %221 = arith.maximumf %219, %220 : vector<8x1xf32>
    %cst_122 = arith.constant 9.99999974E-6 : f32
    %222 = vector.broadcast %cst_122 : f32 to vector<8x1xf32>
    %223 = arith.addf %221, %222 : vector<8x1xf32>
    %224 = math.rsqrt %223 : vector<8x1xf32>
    %225 = vector.broadcast %215 : vector<8x1xf32> to vector<8x128xf32>
    %226 = arith.subf %208, %225 : vector<8x128xf32>
    %227 = vector.broadcast %224 : vector<8x1xf32> to vector<8x128xf32>
    %228 = arith.mulf %226, %227 : vector<8x128xf32>
    %c3_123 = arith.constant 3 : index
    %c0_124 = arith.constant 0 : index
    %c0_125 = arith.constant 0 : index
    %229 = vector.load %arg4[%c3_123, %c0_124, %c0_125] : memref<5x1x128xf32, #tpu.memory_space<vmem>>, vector<1x1x128xf32>
    %230 = vector.shape_cast %229 : vector<1x1x128xf32> to vector<1x128xf32>
    %231 = vector.broadcast %230 : vector<1x128xf32> to vector<8x128xf32>
    %232 = arith.mulf %228, %231 : vector<8x128xf32>
    %c3_126 = arith.constant 3 : index
    %c0_127 = arith.constant 0 : index
    %c0_128 = arith.constant 0 : index
    %233 = vector.load %arg5[%c3_126, %c0_127, %c0_128] : memref<5x1x128xf32, #tpu.memory_space<vmem>>, vector<1x1x128xf32>
    %234 = vector.shape_cast %233 : vector<1x1x128xf32> to vector<1x128xf32>
    %235 = vector.broadcast %234 : vector<1x128xf32> to vector<8x128xf32>
    %236 = arith.addf %232, %235 : vector<8x128xf32>
    %237 = arith.truncf %236 : vector<8x128xf32> to vector<8x128xbf16>
    %c12 = arith.constant 12 : index
    %c0_129 = arith.constant 0 : index
    %c0_130 = arith.constant 0 : index
    %238 = vector.load %arg2[%c12, %c0_129, %c0_130] : memref<18x128x128xbf16, #tpu.memory_space<vmem>>, vector<1x128x128xbf16>
    %239 = vector.shape_cast %238 : vector<1x128x128xbf16> to vector<128x128xbf16>
    %cst_131 = arith.constant dense<0.000000e+00> : vector<8x128xf32>
    %240 = tpu.matmul %237, %239, %cst_131 {dimension_numbers = #tpu.dot_dimension_numbers<[1], [0], [0], [1], [0, 0, 1, 1], [], []>} : vector<8x128xbf16>, vector<128x128xbf16>, vector<8x128xf32> -> vector<8x128xf32>
    %c12_132 = arith.constant 12 : index
    %c0_133 = arith.constant 0 : index
    %c0_134 = arith.constant 0 : index
    %241 = vector.load %arg3[%c12_132, %c0_133, %c0_134] : memref<18x1x128xf32, #tpu.memory_space<vmem>>, vector<1x1x128xf32>
    %242 = vector.shape_cast %241 : vector<1x1x128xf32> to vector<1x128xf32>
    %243 = vector.broadcast %242 : vector<1x128xf32> to vector<8x128xf32>
    %244 = arith.addf %240, %243 : vector<8x128xf32>
    %cst_135 = arith.constant 0.000000e+00 : f32
    %245 = vector.broadcast %cst_135 : f32 to vector<8x128xf32>
    %246 = arith.maximumf %244, %245 : vector<8x128xf32>
    %247 = arith.truncf %246 : vector<8x128xf32> to vector<8x128xbf16>
    %c13 = arith.constant 13 : index
    %c0_136 = arith.constant 0 : index
    %c0_137 = arith.constant 0 : index
    %248 = vector.load %arg2[%c13, %c0_136, %c0_137] : memref<18x128x128xbf16, #tpu.memory_space<vmem>>, vector<1x128x128xbf16>
    %249 = vector.shape_cast %248 : vector<1x128x128xbf16> to vector<128x128xbf16>
    %cst_138 = arith.constant dense<0.000000e+00> : vector<8x128xf32>
    %250 = tpu.matmul %247, %249, %cst_138 {dimension_numbers = #tpu.dot_dimension_numbers<[1], [0], [0], [1], [0, 0, 1, 1], [], []>} : vector<8x128xbf16>, vector<128x128xbf16>, vector<8x128xf32> -> vector<8x128xf32>
    %c13_139 = arith.constant 13 : index
    %c0_140 = arith.constant 0 : index
    %c0_141 = arith.constant 0 : index
    %251 = vector.load %arg3[%c13_139, %c0_140, %c0_141] : memref<18x1x128xf32, #tpu.memory_space<vmem>>, vector<1x1x128xf32>
    %252 = vector.shape_cast %251 : vector<1x1x128xf32> to vector<1x128xf32>
    %253 = vector.broadcast %252 : vector<1x128xf32> to vector<8x128xf32>
    %254 = arith.addf %250, %253 : vector<8x128xf32>
    %cst_142 = arith.constant 0.000000e+00 : f32
    %255 = vector.broadcast %cst_142 : f32 to vector<8x128xf32>
    %256 = arith.maximumf %254, %255 : vector<8x128xf32>
    %257 = arith.truncf %256 : vector<8x128xf32> to vector<8x128xbf16>
    %c14 = arith.constant 14 : index
    %c0_143 = arith.constant 0 : index
    %c0_144 = arith.constant 0 : index
    %258 = vector.load %arg2[%c14, %c0_143, %c0_144] : memref<18x128x128xbf16, #tpu.memory_space<vmem>>, vector<1x128x128xbf16>
    %259 = vector.shape_cast %258 : vector<1x128x128xbf16> to vector<128x128xbf16>
    %cst_145 = arith.constant dense<0.000000e+00> : vector<8x128xf32>
    %260 = tpu.matmul %257, %259, %cst_145 {dimension_numbers = #tpu.dot_dimension_numbers<[1], [0], [0], [1], [0, 0, 1, 1], [], []>} : vector<8x128xbf16>, vector<128x128xbf16>, vector<8x128xf32> -> vector<8x128xf32>
    %c14_146 = arith.constant 14 : index
    %c0_147 = arith.constant 0 : index
    %c0_148 = arith.constant 0 : index
    %261 = vector.load %arg3[%c14_146, %c0_147, %c0_148] : memref<18x1x128xf32, #tpu.memory_space<vmem>>, vector<1x1x128xf32>
    %262 = vector.shape_cast %261 : vector<1x1x128xf32> to vector<1x128xf32>
    %263 = vector.broadcast %262 : vector<1x128xf32> to vector<8x128xf32>
    %264 = arith.addf %260, %263 : vector<8x128xf32>
    %265 = arith.truncf %264 : vector<8x128xf32> to vector<8x128xbf16>
    %266 = arith.extf %265 : vector<8x128xbf16> to vector<8x128xf32>
    %267 = arith.addf %266, %236 : vector<8x128xf32>
    %cst_149 = arith.constant dense<0.000000e+00> : vector<8xf32>
    %268 = vector.multi_reduction <add>, %267, %cst_149 [1] : vector<8x128xf32> to vector<8xf32>
    %269 = vector.shape_cast %268 : vector<8xf32> to vector<8x1xf32>
    %270 = arith.mulf %267, %267 : vector<8x128xf32>
    %cst_150 = arith.constant dense<0.000000e+00> : vector<8xf32>
    %271 = vector.multi_reduction <add>, %270, %cst_150 [1] : vector<8x128xf32> to vector<8xf32>
    %272 = vector.shape_cast %271 : vector<8xf32> to vector<8x1xf32>
    %cst_151 = arith.constant 7.812500e-03 : f32
    %273 = vector.broadcast %cst_151 : f32 to vector<8x1xf32>
    %274 = arith.mulf %269, %273 : vector<8x1xf32>
    %cst_152 = arith.constant 7.812500e-03 : f32
    %275 = vector.broadcast %cst_152 : f32 to vector<8x1xf32>
    %276 = arith.mulf %272, %275 : vector<8x1xf32>
    %277 = arith.mulf %274, %274 : vector<8x1xf32>
    %278 = arith.subf %276, %277 : vector<8x1xf32>
    %cst_153 = arith.constant 0.000000e+00 : f32
    %279 = vector.broadcast %cst_153 : f32 to vector<8x1xf32>
    %280 = arith.maximumf %278, %279 : vector<8x1xf32>
    %cst_154 = arith.constant 9.99999974E-6 : f32
    %281 = vector.broadcast %cst_154 : f32 to vector<8x1xf32>
    %282 = arith.addf %280, %281 : vector<8x1xf32>
    %283 = math.rsqrt %282 : vector<8x1xf32>
    %284 = vector.broadcast %274 : vector<8x1xf32> to vector<8x128xf32>
    %285 = arith.subf %267, %284 : vector<8x128xf32>
    %286 = vector.broadcast %283 : vector<8x1xf32> to vector<8x128xf32>
    %287 = arith.mulf %285, %286 : vector<8x128xf32>
    %c4_155 = arith.constant 4 : index
    %c0_156 = arith.constant 0 : index
    %c0_157 = arith.constant 0 : index
    %288 = vector.load %arg4[%c4_155, %c0_156, %c0_157] : memref<5x1x128xf32, #tpu.memory_space<vmem>>, vector<1x1x128xf32>
    %289 = vector.shape_cast %288 : vector<1x1x128xf32> to vector<1x128xf32>
    %290 = vector.broadcast %289 : vector<1x128xf32> to vector<8x128xf32>
    %291 = arith.mulf %287, %290 : vector<8x128xf32>
    %c4_158 = arith.constant 4 : index
    %c0_159 = arith.constant 0 : index
    %c0_160 = arith.constant 0 : index
    %292 = vector.load %arg5[%c4_158, %c0_159, %c0_160] : memref<5x1x128xf32, #tpu.memory_space<vmem>>, vector<1x1x128xf32>
    %293 = vector.shape_cast %292 : vector<1x1x128xf32> to vector<1x128xf32>
    %294 = vector.broadcast %293 : vector<1x128xf32> to vector<8x128xf32>
    %295 = arith.addf %291, %294 : vector<8x128xf32>
    %296 = arith.truncf %295 : vector<8x128xf32> to vector<8x128xbf16>
    %c15 = arith.constant 15 : index
    %c0_161 = arith.constant 0 : index
    %c0_162 = arith.constant 0 : index
    %297 = vector.load %arg2[%c15, %c0_161, %c0_162] : memref<18x128x128xbf16, #tpu.memory_space<vmem>>, vector<1x128x128xbf16>
    %298 = vector.shape_cast %297 : vector<1x128x128xbf16> to vector<128x128xbf16>
    %cst_163 = arith.constant dense<0.000000e+00> : vector<8x128xf32>
    %299 = tpu.matmul %296, %298, %cst_163 {dimension_numbers = #tpu.dot_dimension_numbers<[1], [0], [0], [1], [0, 0, 1, 1], [], []>} : vector<8x128xbf16>, vector<128x128xbf16>, vector<8x128xf32> -> vector<8x128xf32>
    %c15_164 = arith.constant 15 : index
    %c0_165 = arith.constant 0 : index
    %c0_166 = arith.constant 0 : index
    %300 = vector.load %arg3[%c15_164, %c0_165, %c0_166] : memref<18x1x128xf32, #tpu.memory_space<vmem>>, vector<1x1x128xf32>
    %301 = vector.shape_cast %300 : vector<1x1x128xf32> to vector<1x128xf32>
    %302 = vector.broadcast %301 : vector<1x128xf32> to vector<8x128xf32>
    %303 = arith.addf %299, %302 : vector<8x128xf32>
    %cst_167 = arith.constant 0.000000e+00 : f32
    %304 = vector.broadcast %cst_167 : f32 to vector<8x128xf32>
    %305 = arith.maximumf %303, %304 : vector<8x128xf32>
    %306 = arith.truncf %305 : vector<8x128xf32> to vector<8x128xbf16>
    %c16 = arith.constant 16 : index
    %c0_168 = arith.constant 0 : index
    %c0_169 = arith.constant 0 : index
    %307 = vector.load %arg2[%c16, %c0_168, %c0_169] : memref<18x128x128xbf16, #tpu.memory_space<vmem>>, vector<1x128x128xbf16>
    %308 = vector.shape_cast %307 : vector<1x128x128xbf16> to vector<128x128xbf16>
    %cst_170 = arith.constant dense<0.000000e+00> : vector<8x128xf32>
    %309 = tpu.matmul %306, %308, %cst_170 {dimension_numbers = #tpu.dot_dimension_numbers<[1], [0], [0], [1], [0, 0, 1, 1], [], []>} : vector<8x128xbf16>, vector<128x128xbf16>, vector<8x128xf32> -> vector<8x128xf32>
    %c16_171 = arith.constant 16 : index
    %c0_172 = arith.constant 0 : index
    %c0_173 = arith.constant 0 : index
    %310 = vector.load %arg3[%c16_171, %c0_172, %c0_173] : memref<18x1x128xf32, #tpu.memory_space<vmem>>, vector<1x1x128xf32>
    %311 = vector.shape_cast %310 : vector<1x1x128xf32> to vector<1x128xf32>
    %312 = vector.broadcast %311 : vector<1x128xf32> to vector<8x128xf32>
    %313 = arith.addf %309, %312 : vector<8x128xf32>
    %cst_174 = arith.constant 0.000000e+00 : f32
    %314 = vector.broadcast %cst_174 : f32 to vector<8x128xf32>
    %315 = arith.maximumf %313, %314 : vector<8x128xf32>
    %316 = arith.truncf %315 : vector<8x128xf32> to vector<8x128xbf16>
    %c17 = arith.constant 17 : index
    %c0_175 = arith.constant 0 : index
    %c0_176 = arith.constant 0 : index
    %317 = vector.load %arg2[%c17, %c0_175, %c0_176] : memref<18x128x128xbf16, #tpu.memory_space<vmem>>, vector<1x128x128xbf16>
    %318 = vector.shape_cast %317 : vector<1x128x128xbf16> to vector<128x128xbf16>
    %cst_177 = arith.constant dense<0.000000e+00> : vector<8x128xf32>
    %319 = tpu.matmul %316, %318, %cst_177 {dimension_numbers = #tpu.dot_dimension_numbers<[1], [0], [0], [1], [0, 0, 1, 1], [], []>} : vector<8x128xbf16>, vector<128x128xbf16>, vector<8x128xf32> -> vector<8x128xf32>
    %c17_178 = arith.constant 17 : index
    %c0_179 = arith.constant 0 : index
    %c0_180 = arith.constant 0 : index
    %320 = vector.load %arg3[%c17_178, %c0_179, %c0_180] : memref<18x1x128xf32, #tpu.memory_space<vmem>>, vector<1x1x128xf32>
    %321 = vector.shape_cast %320 : vector<1x1x128xf32> to vector<1x128xf32>
    %322 = vector.broadcast %321 : vector<1x128xf32> to vector<8x128xf32>
    %323 = arith.addf %319, %322 : vector<8x128xf32>
    %324 = arith.truncf %323 : vector<8x128xf32> to vector<8x128xbf16>
    %325 = arith.extf %324 : vector<8x128xbf16> to vector<8x128xf32>
    %326 = arith.addf %325, %295 : vector<8x128xf32>
    %c0_181 = arith.constant 0 : index
    %c0_182 = arith.constant 0 : index
    %327 = vector.load %arg6[%c0_181, %c0_182] : memref<8x128xf32, #tpu.memory_space<vmem>>, vector<8x128xf32>
    tpu.vector_store %arg6[%c0_181, %c0_182], %326 {strides = array<i32>} : memref<8x128xf32, #tpu.memory_space<vmem>>, vector<8x128xf32>,
    return
  }
  func.func @transform_0(%arg0: i32) -> (i32, i32) {
    %c0_i32 = arith.constant 0 : i32
    %c0_i32_0 = arith.constant 0 : i32
    return %arg0, %c0_i32 : i32, i32
  }
  func.func @transform_1(%arg0: i32) -> (i32, i32, i32) {
    %c0_i32 = arith.constant 0 : i32
    %c0_i32_0 = arith.constant 0 : i32
    %c0_i32_1 = arith.constant 0 : i32
    %c0_i32_2 = arith.constant 0 : i32
    return %c0_i32, %c0_i32_0, %c0_i32_1 : i32, i32, i32
  }
  func.func @transform_2(%arg0: i32) -> (i32, i32, i32) {
    %c0_i32 = arith.constant 0 : i32
    %c0_i32_0 = arith.constant 0 : i32
    %c0_i32_1 = arith.constant 0 : i32
    %c0_i32_2 = arith.constant 0 : i32
    return %c0_i32, %c0_i32_0, %c0_i32_1 : i32, i32, i32
  }
  func.func @transform_3(%arg0: i32) -> (i32, i32, i32) {
    %c0_i32 = arith.constant 0 : i32
    %c0_i32_0 = arith.constant 0 : i32
    %c0_i32_1 = arith.constant 0 : i32
    %c0_i32_2 = arith.constant 0 : i32
    return %c0_i32, %c0_i32_0, %c0_i32_1 : i32, i32, i32
  }
  func.func @transform_4(%arg0: i32) -> (i32, i32, i32) {
    %c0_i32 = arith.constant 0 : i32
    %c0_i32_0 = arith.constant 0 : i32
    %c0_i32_1 = arith.constant 0 : i32
    %c0_i32_2 = arith.constant 0 : i32
    return %c0_i32, %c0_i32_0, %c0_i32_1 : i32, i32, i32
  }
  func.func @transform_5(%arg0: i32) -> (i32, i32) {
    %c0_i32 = arith.constant 0 : i32
    %c0_i32_0 = arith.constant 0 : i32
    return %arg0, %c0_i32 : i32, i32
  }
}

</mosaic_0001>

<bundles_post_ra>
// kernel: half_bignet_forward.1
= control target key start
LH: loop header
LB: loop body
LE: loop exit
PB: predicated region body
PF: predicated region fallthrough
CT: control target
= control target key end

     0   :  { %10 = vsyncpa [#allocation3], 0  ;;  %s3454_s0 = inlined_call_operand.hbm [shape: f32[16,128], index: 0, kind: input, shape index: {}]   ;;  %s3455_s1 = inlined_call_operand.hbm [shape: bf16[18,128,128], index: 1, kind: input, shape index: {}]   ;;  %s3456_s2 = inlined_call_operand.hbm [shape: f32[18,1,128], index: 2, kind: input, shape index: {}]   ;;  %s3457_s3 = inlined_call_operand.hbm [shape: f32[5,1,128], index: 3, kind: input, shape index: {}]   ;;  %s3458_s4 = inlined_call_operand.hbm [shape: f32[5,1,128], index: 4, kind: input, shape index: {}]   ;;  %s3459_s5 = inlined_call_operand.hbm [shape: f32[16,128], index: 5, kind: output, shape index: {}]  }
   0x1   :  { %12 = vsyncpa [#allocation3 + $0x1], 0 }
   0x2   :  { %13 = vsyncpa [#allocation6], 0 }
   0x3   :  { %14 = vsyncpa [#allocation9], 0 }
   0x4   :  { %15 = vsyncpa [#allocation4], 0 }
   0x5   :  { %17 = vsyncpa [#allocation4 + $0x1], 0  ;;  %s3280_s18 = smov 0   ;;  %s3282_s19 = smov 0  }
   0x6   :  { %s3284_s20 = smov 0   ;;  %s3286_s21 = smov 0  }
   0x7 LB: > { %s175_s24 = sshll.u32 %s3455_s1, 4  ;;  %s3304_s25 = sadd.s32 4294967295, %s3240_s21   ;;  %s3240_s21 = sphi %s3286_s21, %s3471_s21   ;;  %s3236_s20 = sphi %s3284_s20, %s3470_s20   ;;  %s3232_s19 = sphi %s3282_s19, %s3469_s19   ;;  %s3228_s18 = sphi %s3280_s18, %s3468_s18   ;;  %s176_s24 = int_to_ptr.hbm [resolvable:$true] %s175_s24 }
   0x8   : > { %p2148_p0 = scmp.ge.s32.totalorder %s3240_s21, 1  ;;  %p44_p1 = scmp.eq.s32.totalorder %s3304_s25, 0 }
   0x9   : > { %p164_p2 = scmp.lt.s32.totalorder %s3240_s21, 3  ;;  %s3242_s27 = smov [#allocation5]  }
   0xa   : > { %s177_s28 = sshll.u32 %s3242_s27, 4  ;;  %s203_s7 = sshll.u32 %s3457_s3, 4  ;;  %s178_s28 = int_to_ptr.vmem [resolvable:$true] %s177_s28  ;;  %s204_s7 = int_to_ptr.hbm [resolvable:$true] %s203_s7 }
   0xb   : > { %p3309_p3 = pnand %p2148_p0, %p164_p2  ;;  %s3243_s8 = smov 64  }
   0xc   : > { %s3244_s9 = smov 4   ;;  %s3245_s10 = smov [#allocation8]  }
   0xd   : > { %p2907_p4 = pneg %p3309_p3  ;;  %s205_s11 = sshll.u32 %s3245_s10, 4  ;;  %s206_s11 = int_to_ptr.vmem [resolvable:$true] %s205_s11 }
   0xe   : > { %s189_s14 = sshll.u32 %s3456_s2, 4  ;;  %s3246_s15 = smov 16   ;;  %s190_s14 = int_to_ptr.hbm [resolvable:$true] %s189_s14 }
   0xf   : > { %p3318_p6 = pnand %p2907_p4, %p44_p1  ;;  %s3247_s16 = smov 1  }
  0x10   : > { %s217_s23 = sshll.u32 %s3458_s4, 4  ;;  %s2147_s6 = sadd.s32 4294967294, %s3240_s21   ;;  %s218_s23 = int_to_ptr.hbm [resolvable:$true] %s217_s23 }
  0x11   : > { %2910 = dma.hbm_to_vmem [thread:$0]  (!%p3318_p6), %s176_s24, 18432, %s178_s28, [#allocation6], %s3243_s8, %s3243_s8, %s3244_s9  }
  0x12   : > { %2916 = dma.hbm_to_vmem [thread:$0]  (!%p3318_p6), %s204_s7, 80, %s206_s11, [#allocation9], %s3246_s15, %s3246_s15, %s3247_s16  }
  0x13   : > { %s3248_s24 = smov [#allocation7]   ;;  %s3249_s28 = smov [#allocation10]  }
  0x14   : > { %s191_s27 = sshll.u32 %s3248_s24, 4  ;;  %s219_s30 = sshll.u32 %s3249_s28, 4  ;;  %s192_s27 = int_to_ptr.vmem [resolvable:$true] %s191_s27  ;;  %s220_s30 = int_to_ptr.vmem [resolvable:$true] %s219_s30 }
  0x15   : > { %2913 = dma.hbm_to_vmem [thread:$0]  (!%p3318_p6), %s190_s14, 288, %s192_s27, [#allocation6], %s3246_s15, %s3246_s15, %s3247_s16  }
  0x16   : > { %2919 = dma.hbm_to_vmem [thread:$0]  (!%p3318_p6), %s218_s23, 80, %s220_s30, [#allocation9], %s3246_s15, %s3246_s15, %s3247_s16  }
  0x17   : > { %s3341_s7 = sadd.s32 1, %s3240_s21   ;;  %s30_s9 = sadd.s32 1, %s3236_s20 }
  0x18   : > { %s27_s8 = ssub.s32 %s3240_s21, %s3341_s7  ;;  %p37_p8 = scmp.ne.s32.totalorder %s3236_s20, %s3232_s19 }
  0x19   : > { %p28_p7 = scmp.eq.s32.totalorder %s27_s8, 0  ;;  %p38_p9 = scmp.eq.s32.totalorder %s3240_s21, 0 }
  0x1a   : > { %p43_p10 = scmp.ne.s32.totalorder %s3232_s19, %s3228_s18  ;;  %p151_p13 = scmp.eq.s32.totalorder %s3304_s25, 1 }
  0x1b   : > { %s3352_s10 = scalar_select %p28_p7, %s3236_s20, %s30_s9  }
  0x1c   : > { %p3354_p11 = por %p38_p9, %p37_p8  ;;  %p3360_p12 = por %p44_p1, %p43_p10 }
  0x1d   : > { %p157_p0 = scmp.eq.s32.totalorder %s2147_s6, 1  ;;  %p2932_p2 = scmp.lt.s32.totalorder %s3240_s21, 2 }
  0x1e   : > { %s233_s12 = sand.u32 1, %s3236_s20   ;;  %p3367_p4 = por %p151_p13, %p37_p8 }
  0x1f   : > { %p3371_p6 = por %p157_p0, %p43_p10  ;;  %s2154_s15 = sshll.u32 %s233_s12, 3 }
  0x20   : > { %s2155_s16 = sshll.u32 %s3240_s21, 3  ;;  %s237_s24 = scalar_lea.vmem [#allocation2], %s2154_s15 }
  0x21   : > { %s241_s23 = scalar_lea.hbm %s3454_s0, %s2155_s16  ;;  %s245_s27 = sshll.u32 %s237_s24, 4  ;;  %s246_s27 = int_to_ptr.vmem [resolvable:$true] %s245_s27 }
  0x22   : > { %s243_s28 = sshll.u32 %s241_s23, 4  ;;  %p3381_p7 = pnand %p2932_p2, %p3354_p11  ;;  %s244_s28 = int_to_ptr.hbm [resolvable:$true] %s243_s28 }
  0x23   : > { %s234_s6 = scalar_lea.sflag [#allocation3], %s233_s12  ;;  %s3136_s8 = sshra.s32 %s244_s28, 4  ;;  %s3137_s8 = int_to_ptr.hbm [resolvable:$true] %s3136_s8 }
  0x24   : > { %s3138_s9 = scalar_lea.hbm %s3137_s8, 8  ;;  %p3140_p9 = pneg %p3381_p7 }
  0x25   : > { %p3139_p8 = scmp.ne.s32.totalorder %s3137_s8, %s3138_s9  ;;  %s3143_s17 = scalar_lea.hbm %s3454_s0, 16 }
  0x26   : > { %p3144_p11 = scmp.lt.s32.totalorder %s3137_s8, %s3454_s0  ;;  %p3145_p0 = scmp.lt.s32.totalorder %s3143_s17, %s3138_s9 }
  0x27   : > { %p3141_p10 = pnand %p3140_p9, %p3139_p8 }
  0x28   : > { %p3146_p2 = por %p3145_p0, %p3144_p11 }
  0x29   : > { %p3142_p13 = pneg %p3141_p10 }
  0x2b   : > { %p3147_p5 = pnand %p3146_p2, %p3142_p13 }
  0x2d   : > { %3150 = shalt.err (!%p3147_p5)
}
  0x2e   : > { %2923 = dma.hbm_to_vmem [thread:$0]  (!%p3381_p7), %s244_s28, 128, %s246_s27, %s234_s6  }
  0x2f   : > { %254 = sbr.rel (%p3309_p3) target bundleno = 3306 (0xcea), region = 40  ;;  %s3398_s12 = sand.u32 (!%p3309_p3), 1, %s3232_s19  }
  0x30   : > { %s2157_s23 = sshll.u32 (!%p3309_p3), %s3398_s12, 3  ;;  %s257_s24 = scalar_lea.sflag (!%p3309_p3), [#allocation3], %s3398_s12 }
  0x31   : > { %s3404_s8 = scalar_lea.vmem (!%p3309_p3), [#allocation2], %s2157_s23 }
  0x34   : > { %3211 = dma.done.wait (%p3360_p12), %s257_s24, 128  }
  0x35   : > { %3213 = vsyncadd (%p3360_p12), %s257_s24, 4294967168 }
  0x36   : > { %3215 = dma.done.wait (%p44_p1), [#allocation6], 18720  }
  0x37   : > { %3217 = vsyncadd (%p44_p1), [#allocation6], 4294948576 }
  0x38   : > { %3219 = dma.done.wait (%p44_p1), [#allocation9], 160  }
  0x39   : > { %3221 = vsyncadd (%p44_p1), [#allocation9], 4294967136  ;;  %v2750_v0 = vld [vmem:[#allocation5 + $0x38] sm:$0xff]  ;;  %v2749_v1 = vld [vmem:[#allocation5 + $0x30] sm:$0xff]  ;;  %s2740_s26 = sshll.u32 %s3304_s25, 3  ;;  %s307_s30 = scalar_lea.vmem [#allocation11], %s2157_s23 }
  0x3a   : > { %378 = vmatpush.bf16.msra.mxu0 %v2750_v0  ;;  %v2758_v2 = vld [vmem:[#allocation5 + $0x78] sm:$0xff]  ;;  %v2748_v3 = vld [vmem:[#allocation5 + $0x28] sm:$0xff]  ;;  %v2757_v4 = vld [vmem:[#allocation5 + $0x70] sm:$0xff]  ;;  %s2034_s28 = scalar_lea.hbm %s3459_s5, %s2740_s26  ;;  %s2036_s6 = sshll.u32 %s307_s30, 4  ;;  %s2037_s6 = int_to_ptr.vmem [resolvable:$true] %s2036_s6 }
  0x3b   : > { %463 = vmatpush.bf16.msra.mxu1 %v2758_v2  ;;  %v2756_v5 = vld [vmem:[#allocation5 + $0x68] sm:$0xff]  ;;  %v2747_v6 = vld [vmem:[#allocation5 + $0x20] sm:$0xff]  ;;  %v2746_v8 = vld [vmem:[#allocation5 + $0x18] sm:$0xff]  ;;  %s2038_s9 = sshll.u32 %s2034_s28, 4  ;;  %s2024_s15 = scalar_lea.sflag [#allocation4], %s3398_s12  ;;  %s2039_s9 = int_to_ptr.hbm [resolvable:$true] %s2038_s9 }
  0x3c   : > { %v2755_v7 = vld [vmem:[#allocation5 + $0x60] sm:$0xff]  ;;  %v2754_v9 = vld [vmem:[#allocation5 + $0x58] sm:$0xff]  ;;  %v2745_v10 = vld [vmem:[#allocation5 + $0x10] sm:$0xff]  ;;  %s3180_s25 = sshra.s32 %s2039_s9, 4  ;;  %s3186_s11 = scalar_lea.hbm %s3459_s5, 16  ;;  %s3181_s25 = int_to_ptr.hbm [resolvable:$true] %s3180_s25 }
  0x3d   : > { %v2753_v11 = vld [vmem:[#allocation5 + $0x50] sm:$0xff]  ;;  %v2744_v12 = vld [vmem:[#allocation5 + $0x8] sm:$0xff]  ;;  %v2743_v13 = vld [vmem:[#allocation5] sm:$0xff]  ;;  %s3182_s16 = scalar_lea.hbm %s3181_s25, 8  ;;  %p3187_p12 = scmp.lt.s32.totalorder %s3181_s25, %s3459_s5 }
  0x3e   : > { %379 = vmatpush.bf16.msra.mxu0 %v2749_v1  ;;  %v308_v14 = vld [vmem:[%s3404_s8] sm:$0xff]  ;;  %v2752_v16 = vld [vmem:[#allocation5 + $0x48] sm:$0xff]  ;;  %v2751_v17 = vld [vmem:[#allocation5 + $0x40] sm:$0xff]  ;;  %p3183_p1 = scmp.ne.s32.totalorder %s3181_s25, %s3182_s16  ;;  %p3188_p7 = scmp.lt.s32.totalorder %s3186_s11, %s3182_s16 }
  0x3f   : > { %464 = vmatpush.bf16.msra.mxu1 %v2757_v4  ;;  %v309_v15 = vpack.c.bf16 %v308_v14, %v308_v14  ;;  %v2766_v18 = vld [vmem:[#allocation5 + $0xb8] sm:$0xff]  ;;  %v2765_v19 = vld [vmem:[#allocation5 + $0xb0] sm:$0xff]  ;;  %v2764_v20 = vld [vmem:[#allocation5 + $0xa8] sm:$0xff] }
  0x40   : > { %548 = vmatpush.bf16.msra.mxu2 %v2766_v18  ;;  %v2763_v21 = vld [vmem:[#allocation5 + $0xa0] sm:$0xff]  ;;  %v2762_v22 = vld [vmem:[#allocation5 + $0x98] sm:$0xff]  ;;  %v2761_v23 = vld [vmem:[#allocation5 + $0x90] sm:$0xff]  ;;  %p3184_p3 = pnand %p3183_p1, %p3367_p4  ;;  %p3189_p8 = por %p3188_p7, %p3187_p12 }
  0x41   : > { %v2978_v24 = vld [vmem:[#allocation7] ss:$0 sm:$0xff]  ;;  %v2760_v30 = vld [vmem:[#allocation5 + $0x88] sm:$0xff]  ;;  %v2979_v32 = vld [vmem:[#allocation7 + $0x1] ss:$0 sm:$0xff] }
  0x42   : > { %380 = vmatpush.bf16.msra.mxu0 %v2748_v3  ;;  %v2759_v31 = vld [vmem:[#allocation5 + $0x80] sm:$0xff]  ;;  %v2774_v46 = vld [vmem:[#allocation5 + $0xf8] sm:$0xff]  ;;  %v2773_v47 = vld [vmem:[#allocation5 + $0xf0] sm:$0xff]  ;;  %p3185_p5 = pneg %p3184_p3 }
  0x43   : > { %465 = vmatpush.bf16.msra.mxu1 %v2756_v5  ;;  %v2980_v38 = vld [vmem:[#allocation7 + $0x2] ss:$0 sm:$0xff]  ;;  %668 = vmatpush.bf16.msra.mxu3 %v2774_v46  ;;  %v2772_v48 = vld [vmem:[#allocation5 + $0xe8] sm:$0xff]  ;;  %v2770_v50 = vld [vmem:[#allocation5 + $0xd8] sm:$0xff] }
  0x44   : > { %549 = vmatpush.bf16.msra.mxu2 %v2765_v19  ;;  %v2771_v49 = vld [vmem:[#allocation5 + $0xe0] sm:$0xff]  ;;  %v2769_v51 = vld [vmem:[#allocation5 + $0xd0] sm:$0xff]  ;;  %v2768_v53 = vld [vmem:[#allocation5 + $0xc8] sm:$0xff]  ;;  %p3190_p9 = pnand %p3189_p8, %p3185_p5 }
  0x45   : > { %v2767_v54 = vld [vmem:[#allocation5 + $0xc0] sm:$0xff]  ;;  %v2782_v60 = vld [vmem:[#allocation5 + $0x138] sm:$0xff]  ;;  %v2781_v62 = vld [vmem:[#allocation5 + $0x130] sm:$0xff] }
  0x46   : > { %381 = vmatpush.bf16.msra.mxu0 %v2747_v6  ;;  %v2780_v0 = vld [vmem:[#allocation5 + $0x128] sm:$0xff]  ;;  %v2779_v1 = vld [vmem:[#allocation5 + $0x120] sm:$0xff]  ;;  %v2778_v4 = vld [vmem:[#allocation5 + $0x118] sm:$0xff] }
  0x47   : > { %466 = vmatpush.bf16.msra.mxu1 %v2755_v7  ;;  %669 = vmatpush.bf16.msra.mxu3 %v2773_v47  ;;  %v2777_v7 = vld [vmem:[#allocation5 + $0x110] sm:$0xff]  ;;  %v2776_v18 = vld [vmem:[#allocation5 + $0x108] sm:$0xff]  ;;  %v2775_v19 = vld [vmem:[#allocation5 + $0x100] sm:$0xff] }
  0x48   : > { %550 = vmatpush.bf16.msra.mxu2 %v2764_v20  ;;  %v2790_v20 = vld [vmem:[#allocation5 + $0x178] sm:$0xff] }
  0x4a   : > { %382 = vmatpush.bf16.msra.mxu0 %v2746_v8 }
  0x4b   : > { %467 = vmatpush.bf16.msra.mxu1 %v2754_v9  ;;  %670 = vmatpush.bf16.msra.mxu3 %v2772_v48  ;;  %v2798_v48 = vld [vmem:[#allocation5 + $0x1b8] sm:$0xff] }
  0x4c   : > { %551 = vmatpush.bf16.msra.mxu2 %v2763_v21  ;;  %v2789_v21 = vld [vmem:[#allocation5 + $0x170] sm:$0xff] }
  0x4e   : > { %383 = vmatpush.bf16.msra.mxu0 %v2745_v10 }
  0x4f   : > { %468 = vmatpush.bf16.msra.mxu1 %v2753_v11  ;;  %671 = vmatpush.bf16.msra.mxu3 %v2771_v49  ;;  %v2981_v11 = vld [vmem:[#allocation8] ss:$0 sm:$0xff] }
  0x50   : > { %552 = vmatpush.bf16.msra.mxu2 %v2762_v22  ;;  %v2788_v22 = vld [vmem:[#allocation5 + $0x168] sm:$0xff]  ;;  %v2797_v49 = vld [vmem:[#allocation5 + $0x1b0] sm:$0xff] }
  0x52   : > { %384 = vmatpush.bf16.msra.mxu0 %v2744_v12 }
  0x53   : > { %469 = vmatpush.bf16.msra.mxu1 %v2752_v16  ;;  %672 = vmatpush.bf16.msra.mxu3 %v2770_v50  ;;  %v2796_v50 = vld [vmem:[#allocation5 + $0x1a8] sm:$0xff] }
  0x54   : > { %553 = vmatpush.bf16.msra.mxu2 %v2761_v23  ;;  %v2787_v23 = vld [vmem:[#allocation5 + $0x160] sm:$0xff] }
  0x56   : > { %385 = vmatpush.bf16.msra.mxu0 %v2743_v13 }
  0x57   : > { %470 = vmatpush.bf16.msra.mxu1 %v2751_v17  ;;  %673 = vmatpush.bf16.msra.mxu3 %v2769_v51  ;;  %v2795_v51 = vld [vmem:[#allocation5 + $0x1a0] sm:$0xff] }
  0x58   : > { %554 = vmatpush.bf16.msra.mxu2 %v2760_v30 }
  0x59   : > { %386 = vmatmul.bf16.vlgmr.msra.gmra.mxu0 %v309_v15 }
  0x5a   : > { %753 = vmatpush.bf16.msrb.mxu0 %v2782_v60 }
  0x5b   : > { %674 = vmatpush.bf16.msra.mxu3 %v2768_v53  ;;  %838 = vmatpush.bf16.msrb.mxu1 %v2790_v20  ;;  %v2793_v53 = vld [vmem:[#allocation5 + $0x190] sm:$0xff]  ;;  %v2800_v20 = vld [vmem:[#allocation5 + $0x1c8] sm:$0xff] }
  0x5c   : > { %555 = vmatpush.bf16.msra.mxu2 %v2759_v31 }
  0x5e   : > { %754 = vmatpush.bf16.msrb.mxu0 %v2781_v62  ;;  %v2806_v62 = vld [vmem:[#allocation5 + $0x1f8] sm:$0xff] }
  0x5f   : > { %675 = vmatpush.bf16.msra.mxu3 %v2767_v54  ;;  %839 = vmatpush.bf16.msrb.mxu1 %v2789_v21  ;;  %v2799_v21 = vld [vmem:[#allocation5 + $0x1c0] sm:$0xff] }
  0x60   : > { %960 = vmatpush.bf16.msrb.mxu2 %v2798_v48 }
  0x62   : > { %755 = vmatpush.bf16.msrb.mxu0 %v2780_v0  ;;  %v2805_v0 = vld [vmem:[#allocation5 + $0x1f0] sm:$0xff] }
  0x63   : > { %840 = vmatpush.bf16.msrb.mxu1 %v2788_v22  ;;  %1045 = vmatpush.bf16.msrb.mxu3 %v2806_v62  ;;  %v2814_v22 = vld [vmem:[#allocation5 + $0x238] sm:$0xff] }
  0x64   : > { %961 = vmatpush.bf16.msrb.mxu2 %v2797_v49 }
  0x66   : > { %756 = vmatpush.bf16.msrb.mxu0 %v2779_v1 }
  0x67   : > { %841 = vmatpush.bf16.msrb.mxu1 %v2787_v23  ;;  %1046 = vmatpush.bf16.msrb.mxu3 %v2805_v0  ;;  %v2813_v23 = vld [vmem:[#allocation5 + $0x230] sm:$0xff]  ;;  %v2830_v0 = vld [vmem:[#allocation5 + $0x2b8] sm:$0xff] }
  0x68   : > { %962 = vmatpush.bf16.msrb.mxu2 %v2796_v50  ;;  %v2822_v50 = vld [vmem:[#allocation5 + $0x278] sm:$0xff] }
  0x6a   : > { %757 = vmatpush.bf16.msrb.mxu0 %v2778_v4 }
  0x6c   : > { %963 = vmatpush.bf16.msrb.mxu2 %v2795_v51  ;;  %v2821_v51 = vld [vmem:[#allocation5 + $0x270] sm:$0xff] }
  0x6e   : > { %758 = vmatpush.bf16.msrb.mxu0 %v2777_v7 }
  0x72   : > { %759 = vmatpush.bf16.msrb.mxu0 %v2776_v18 }
  0x76   : > { %760 = vmatpush.bf16.msrb.mxu0 %v2775_v19 }
  0x7a   : > { %1130 = vmatpush.bf16.msra.mxu0 %v2814_v22  ;;  %v2824_v22 = vld [vmem:[#allocation5 + $0x288] sm:$0xff] }
  0x7e   : > { %1131 = vmatpush.bf16.msra.mxu0 %v2813_v23  ;;  %v2823_v23 = vld [vmem:[#allocation5 + $0x280] sm:$0xff] }
  0xd6   : > { %v387_v25 = vpop.f32.mrf.mxu0 }
  0xd7   : > { %v388_v26 = vadd.f32 %v2978_v24, %v387_v25  ;;  %v2786_v24 = vld [vmem:[#allocation5 + $0x158] sm:$0xff]  ;;  %v2785_v25 = vld [vmem:[#allocation5 + $0x150] sm:$0xff] }
  0xd8   : > { %842 = vmatpush.bf16.msrb.mxu1 %v2786_v24  ;;  %v2812_v24 = vld [vmem:[#allocation5 + $0x228] sm:$0xff] }
  0xd9   : > { %v391_v27 = vmax.f32 %v388_v26, 0.0  ;;  %v2983_v26 = vld [vmem:[#allocation7 + $0x3] ss:$0 sm:$0xff]  ;;  %1132 = vmatpush.bf16.msra.mxu0 %v2812_v24  ;;  %v2838_v24 = vld [vmem:[#allocation5 + $0x2f8] sm:$0xff] }
  0xdb   : > { %v392_v28 = vpack.c.bf16 %v391_v27, %v391_v27 }
  0xdc   : > { %843 = vmatpush.bf16.msrb.mxu1 %v2785_v25  ;;  %v2811_v25 = vld [vmem:[#allocation5 + $0x220] sm:$0xff] }
  0xdd   : > { %471 = vmatmul.bf16.vlgmr.msra.gmra.mxu1 %v392_v28  ;;  %1133 = vmatpush.bf16.msra.mxu0 %v2811_v25  ;;  %v2837_v25 = vld [vmem:[#allocation5 + $0x2f0] sm:$0xff] }
  0xde   : > { %v389_v29 = vpop.f32.mrf.mxu0 }
 0x15a   : > { %v472_v33 = vpop.f32.mrf.mxu1 }
 0x15b   : > { %v473_v34 = vadd.f32 %v2979_v32, %v472_v33  ;;  %v2784_v32 = vld [vmem:[#allocation5 + $0x148] sm:$0xff]  ;;  %v2783_v33 = vld [vmem:[#allocation5 + $0x140] sm:$0xff] }
 0x15c   : > { %844 = vmatpush.bf16.msrb.mxu1 %v2784_v32 }
 0x15d   : > { %v476_v35 = vmax.f32 %v473_v34, 0.0  ;;  %v2984_v34 = vld [vmem:[#allocation7 + $0x4] ss:$0 sm:$0xff] }
 0x15f   : > { %v477_v36 = vpack.c.bf16 %v476_v35, %v476_v35 }
 0x160   : > { %845 = vmatpush.bf16.msrb.mxu1 %v2783_v33 }
 0x161   : > { %556 = vmatmul.bf16.vlgmr.msra.gmra.mxu2 %v477_v36 }
 0x162   : > { %v474_v37 = vpop.f32.mrf.mxu1 }
 0x164   : > { %1252 = vmatpush.bf16.msra.mxu1 %v2822_v50 }
 0x168   : > { %1253 = vmatpush.bf16.msra.mxu1 %v2821_v51 }
 0x1e4   : > { %v557_v39 = vpop.f32.mrf.mxu2 }
 0x1e5   : > { %v558_v40 = vadd.f32 %v2980_v38, %v557_v39 }
 0x1e7   : > { %v561_v41 = vpack.c.bf16 %v558_v40, %v558_v40  ;;  %v2985_v40 = vld [vmem:[#allocation7 + $0x5] ss:$0 sm:$0xff] }
 0x1e9   : > { %v562_v42 = vunpack.c.l.bf16 %v561_v41 }
 0x1eb   : > { %v563_v43 = vadd.f32 %v562_v42, %v308_v14  ;;  %v2982_v14 = vld [vmem:[#allocation10] ss:$0 sm:$0xff] }
 0x1ec   : > { %v559_v44 = vpop.f32.mrf.mxu2 }
 0x1ed   : > { %564 = vadd.xlane.f32.xlu0 %v563_v43  ;;  %v566_v45 = vmul.f32 %v563_v43, %v563_v43 }
 0x1f5   : > { %567 = vadd.xlane.f32.xlu0 %v566_v45 }
 0x260   : > { %v565_v52 = vpop.xlane.xlu0 %564 }
 0x261   : > { %v569_v55 = vmul.f32 0.0078125, %v565_v52  ;;  %v2794_v52 = vld [vmem:[#allocation5 + $0x198] sm:$0xff] }
 0x262   : > { %964 = vmatpush.bf16.msrb.mxu2 %v2794_v52  ;;  %v2820_v52 = vld [vmem:[#allocation5 + $0x268] sm:$0xff] }
 0x263   : > { %v571_v57 = vmul.f32 %v569_v55, %v569_v55  ;;  %v585_v10 = vsub.f32 %v563_v43, %v569_v55  ;;  %v2792_v55 = vld [vmem:[#allocation5 + $0x188] sm:$0xff]  ;;  %1254 = vmatpush.bf16.msra.mxu1 %v2820_v52  ;;  %v2846_v52 = vld [vmem:[#allocation5 + $0x338] sm:$0xff] }
 0x266   : > { %965 = vmatpush.bf16.msrb.mxu2 %v2793_v53  ;;  %v2819_v53 = vld [vmem:[#allocation5 + $0x260] sm:$0xff] }
 0x267   : > { %1255 = vmatpush.bf16.msra.mxu1 %v2819_v53  ;;  %v2845_v53 = vld [vmem:[#allocation5 + $0x330] sm:$0xff] }
 0x268   : > { %v568_v56 = vpop.xlane.xlu0 %567 }
 0x269   : > { %v570_v58 = vmul.f32 0.0078125, %v568_v56  ;;  %v2791_v56 = vld [vmem:[#allocation5 + $0x180] sm:$0xff] }
 0x26a   : > { %966 = vmatpush.bf16.msrb.mxu2 %v2792_v55  ;;  %v2817_v55 = vld [vmem:[#allocation5 + $0x250] sm:$0xff] }
 0x26b   : > { %v572_v59 = vsub.f32 %v570_v58, %v571_v57 }
 0x26d   : > { %v573_v61 = vmax.f32 %v572_v59, 0.0 }
 0x26e   : > { %967 = vmatpush.bf16.msrb.mxu2 %v2791_v56 }
 0x26f   : > { %v574_v63 = vadd.f32 1e-05, %v573_v61 }
 0x271   : > { %3006 = vrsqrt.f32 %v574_v63  ;;  %vm581_vm1 = vweird.f32 %v574_v63 }
 0x272   : > { %1337 = vmatpush.bf16.msra.mxu2 %v2830_v0 }
 0x277   : > { %v3007_v2 = vpop.eup %3006 }
 0x278   : > { %v576_v3 = vmul.f32 %v3007_v2, %v574_v63  ;;  %vm582_vm0 = vweird.f32 %v3007_v2 }
 0x279   : > { %vm583_vm2 = vmor %vm581_vm1, %vm582_vm0 }
 0x27a   : > { %v577_v5 = vmul.f32 %v3007_v2, %v576_v3  ;;  %v2803_v3 = vld [vmem:[#allocation5 + $0x1e0] sm:$0xff] }
 0x27c   : > { %v578_v6 = vmul.f32 0.5, %v577_v5 }
 0x27e   : > { %v579_v8 = vsub.f32 1.5, %v578_v6  ;;  %v2802_v6 = vld [vmem:[#allocation5 + $0x1d8] sm:$0xff] }
 0x280   : > { %v580_v9 = vmul.f32 %v3007_v2, %v579_v8 }
 0x282   : > { %v584_v12 = vsel %vm583_vm2, %v3007_v2, %v580_v9  ;;  %v2804_v2 = vld [vmem:[#allocation5 + $0x1e8] sm:$0xff]  ;;  %v2801_v9 = vld [vmem:[#allocation5 + $0x1d0] sm:$0xff] }
 0x283   : > { %v586_v13 = vmul.f32 %v585_v10, %v584_v12  ;;  %1047 = vmatpush.bf16.msrb.mxu3 %v2804_v2  ;;  %v2829_v2 = vld [vmem:[#allocation5 + $0x2b0] sm:$0xff] }
 0x284   : > { %1338 = vmatpush.bf16.msra.mxu2 %v2829_v2  ;;  %v2854_v2 = vld [vmem:[#allocation5 + $0x378] sm:$0xff] }
 0x285   : > { %v591_v15 = vmul.f32 %v2981_v11, %v586_v13  ;;  %v2986_v13 = vld [vmem:[#allocation8 + $0x1] ss:$0 sm:$0xff] }
 0x287   : > { %v596_v16 = vadd.f32 %v2982_v14, %v591_v15  ;;  %1048 = vmatpush.bf16.msrb.mxu3 %v2803_v3 }
 0x289   : > { %v597_v17 = vpack.c.bf16 %v596_v16, %v596_v16 }
 0x28b   : > { %676 = vmatmul.bf16.vlgmr.msra.gmra.mxu3 %v597_v17 }
 0x28c   : > { %1049 = vmatpush.bf16.msrb.mxu3 %v2802_v6 }
 0x290   : > { %1050 = vmatpush.bf16.msrb.mxu3 %v2801_v9 }
 0x294   : > { %1051 = vmatpush.bf16.msrb.mxu3 %v2800_v20 }
 0x298   : > { %1052 = vmatpush.bf16.msrb.mxu3 %v2799_v21 }
 0x29c   : > { %1422 = vmatpush.bf16.msra.mxu3 %v2838_v24  ;;  %v2848_v24 = vld [vmem:[#allocation5 + $0x348] sm:$0xff] }
 0x2a0   : > { %1423 = vmatpush.bf16.msra.mxu3 %v2837_v25  ;;  %v2847_v25 = vld [vmem:[#allocation5 + $0x340] sm:$0xff] }
 0x30e   : > { %v677_v27 = vpop.f32.mrf.mxu3 }
 0x30f   : > { %v678_v28 = vadd.f32 %v2983_v26, %v677_v27  ;;  %v2810_v26 = vld [vmem:[#allocation5 + $0x218] sm:$0xff]  ;;  %v2809_v27 = vld [vmem:[#allocation5 + $0x210] sm:$0xff] }
 0x310   : > { %1134 = vmatpush.bf16.msra.mxu0 %v2810_v26  ;;  %v2836_v26 = vld [vmem:[#allocation5 + $0x2e8] sm:$0xff] }
 0x311   : > { %v681_v29 = vmax.f32 %v678_v28, 0.0  ;;  %v2988_v28 = vld [vmem:[#allocation7 + $0x6] ss:$0 sm:$0xff]  ;;  %1424 = vmatpush.bf16.msra.mxu3 %v2836_v26  ;;  %v2862_v26 = vld [vmem:[#allocation5 + $0x3b8] sm:$0xff] }
 0x313   : > { %v682_v30 = vpack.c.bf16 %v681_v29, %v681_v29 }
 0x314   : > { %1135 = vmatpush.bf16.msra.mxu0 %v2809_v27  ;;  %v2835_v27 = vld [vmem:[#allocation5 + $0x2e0] sm:$0xff] }
 0x315   : > { %761 = vmatmul.bf16.vlgmr.msrb.gmra.mxu0 %v682_v30  ;;  %1425 = vmatpush.bf16.msra.mxu3 %v2835_v27  ;;  %v2861_v27 = vld [vmem:[#allocation5 + $0x3b0] sm:$0xff] }
 0x316   : > { %v679_v31 = vpop.f32.mrf.mxu3 }
 0x392   : > { %v762_v35 = vpop.f32.mrf.mxu0 }
 0x393   : > { %v763_v36 = vadd.f32 %v2984_v34, %v762_v35  ;;  %v2808_v34 = vld [vmem:[#allocation5 + $0x208] sm:$0xff]  ;;  %v2807_v35 = vld [vmem:[#allocation5 + $0x200] sm:$0xff] }
 0x394   : > { %1136 = vmatpush.bf16.msra.mxu0 %v2808_v34 }
 0x395   : > { %v766_v37 = vmax.f32 %v763_v36, 0.0  ;;  %v2989_v36 = vld [vmem:[#allocation7 + $0x7] ss:$0 sm:$0xff] }
 0x397   : > { %v767_v38 = vpack.c.bf16 %v766_v37, %v766_v37 }
 0x398   : > { %1137 = vmatpush.bf16.msra.mxu0 %v2807_v35 }
 0x399   : > { %846 = vmatmul.bf16.vlgmr.msrb.gmra.mxu1 %v767_v38 }
 0x39a   : > { %v764_v39 = vpop.f32.mrf.mxu0 }
 0x39c   : > { %1544 = vmatpush.bf16.msrb.mxu0 %v2846_v52 }
 0x3a0   : > { %1545 = vmatpush.bf16.msrb.mxu0 %v2845_v53 }
 0x416   : > { %v847_v41 = vpop.f32.mrf.mxu1 }
 0x417   : > { %v848_v42 = vadd.f32 %v2985_v40, %v847_v41 }
 0x419   : > { %v851_v43 = vpack.c.bf16 %v848_v42, %v848_v42  ;;  %v2990_v42 = vld [vmem:[#allocation7 + $0x8] ss:$0 sm:$0xff] }
 0x41b   : > { %v852_v44 = vunpack.c.l.bf16 %v851_v43 }
 0x41d   : > { %v853_v45 = vadd.f32 %v852_v44, %v596_v16  ;;  %v2987_v16 = vld [vmem:[#allocation10 + $0x1] ss:$0 sm:$0xff] }
 0x41e   : > { %v849_v46 = vpop.f32.mrf.mxu1 }
 0x41f   : > { %854 = vadd.xlane.f32.xlu1 %v853_v45  ;;  %v856_v47 = vmul.f32 %v853_v45, %v853_v45 }
 0x427   : > { %857 = vadd.xlane.f32.xlu1 %v856_v47 }
 0x492   : > { %v855_v54 = vpop.xlane.xlu1 %854 }
 0x493   : > { %v859_v57 = vmul.f32 0.0078125, %v855_v54  ;;  %v2818_v54 = vld [vmem:[#allocation5 + $0x258] sm:$0xff] }
 0x494   : > { %1256 = vmatpush.bf16.msra.mxu1 %v2818_v54  ;;  %v2844_v54 = vld [vmem:[#allocation5 + $0x328] sm:$0xff] }
 0x495   : > { %v861_v59 = vmul.f32 %v859_v57, %v859_v57  ;;  %v875_v12 = vsub.f32 %v853_v45, %v859_v57  ;;  %v2816_v57 = vld [vmem:[#allocation5 + $0x248] sm:$0xff]  ;;  %1546 = vmatpush.bf16.msrb.mxu0 %v2844_v54  ;;  %v2870_v54 = vld [vmem:[#allocation5 + $0x3f8] sm:$0xff] }
 0x498   : > { %1257 = vmatpush.bf16.msra.mxu1 %v2817_v55  ;;  %v2843_v55 = vld [vmem:[#allocation5 + $0x320] sm:$0xff] }
 0x499   : > { %1547 = vmatpush.bf16.msrb.mxu0 %v2843_v55  ;;  %v2869_v55 = vld [vmem:[#allocation5 + $0x3f0] sm:$0xff] }
 0x49a   : > { %v858_v58 = vpop.xlane.xlu1 %857 }
 0x49b   : > { %v860_v60 = vmul.f32 0.0078125, %v858_v58  ;;  %v2815_v58 = vld [vmem:[#allocation5 + $0x240] sm:$0xff] }
 0x49c   : > { %1258 = vmatpush.bf16.msra.mxu1 %v2816_v57  ;;  %v2841_v57 = vld [vmem:[#allocation5 + $0x310] sm:$0xff] }
 0x49d   : > { %v862_v61 = vsub.f32 %v860_v60, %v861_v59 }
 0x49f   : > { %v863_v63 = vmax.f32 %v862_v61, 0.0 }
 0x4a0   : > { %1259 = vmatpush.bf16.msra.mxu1 %v2815_v58  ;;  %v2840_v58 = vld [vmem:[#allocation5 + $0x308] sm:$0xff] }
 0x4a1   : > { %v864_v1 = vadd.f32 1e-05, %v863_v63 }
 0x4a3   : > { %3008 = vrsqrt.f32 %v864_v1  ;;  %vm871_vm4 = vweird.f32 %v864_v1 }
 0x4a4   : > { %1629 = vmatpush.bf16.msrb.mxu1 %v2854_v2 }
 0x4a9   : > { %v3009_v4 = vpop.eup %3008 }
 0x4aa   : > { %v866_v5 = vmul.f32 %v3009_v4, %v864_v1  ;;  %vm872_vm3 = vweird.f32 %v3009_v4 }
 0x4ab   : > { %vm873_vm5 = vmor %vm871_vm4, %vm872_vm3 }
 0x4ac   : > { %v867_v7 = vmul.f32 %v3009_v4, %v866_v5  ;;  %v2827_v5 = vld [vmem:[#allocation5 + $0x2a0] sm:$0xff] }
 0x4ae   : > { %v868_v8 = vmul.f32 0.5, %v867_v7 }
 0x4b0   : > { %v869_v10 = vsub.f32 1.5, %v868_v8  ;;  %v2826_v8 = vld [vmem:[#allocation5 + $0x298] sm:$0xff] }
 0x4b2   : > { %v870_v11 = vmul.f32 %v3009_v4, %v869_v10 }
 0x4b4   : > { %v874_v14 = vsel %vm873_vm5, %v3009_v4, %v870_v11  ;;  %v2828_v4 = vld [vmem:[#allocation5 + $0x2a8] sm:$0xff]  ;;  %v2825_v11 = vld [vmem:[#allocation5 + $0x290] sm:$0xff] }
 0x4b5   : > { %v876_v15 = vmul.f32 %v875_v12, %v874_v14  ;;  %1339 = vmatpush.bf16.msra.mxu2 %v2828_v4  ;;  %v2853_v4 = vld [vmem:[#allocation5 + $0x370] sm:$0xff] }
 0x4b6   : > { %1630 = vmatpush.bf16.msrb.mxu1 %v2853_v4  ;;  %v2878_v4 = vld [vmem:[#allocation5 + $0x438] sm:$0xff] }
 0x4b7   : > { %v882_v17 = vmul.f32 %v2986_v13, %v876_v15  ;;  %v2991_v15 = vld [vmem:[#allocation8 + $0x2] ss:$0 sm:$0xff] }
 0x4b9   : > { %v888_v18 = vadd.f32 %v2987_v16, %v882_v17  ;;  %1340 = vmatpush.bf16.msra.mxu2 %v2827_v5 }
 0x4bb   : > { %v889_v19 = vpack.c.bf16 %v888_v18, %v888_v18 }
 0x4bd   : > { %968 = vmatmul.bf16.vlgmr.msrb.gmra.mxu2 %v889_v19 }
 0x4be   : > { %1341 = vmatpush.bf16.msra.mxu2 %v2826_v8 }
 0x4c2   : > { %1342 = vmatpush.bf16.msra.mxu2 %v2825_v11 }
 0x4c6   : > { %1343 = vmatpush.bf16.msra.mxu2 %v2824_v22 }
 0x4ca   : > { %1344 = vmatpush.bf16.msra.mxu2 %v2823_v23 }
 0x4ce   : > { %1714 = vmatpush.bf16.msrb.mxu2 %v2862_v26  ;;  %v2872_v26 = vld [vmem:[#allocation5 + $0x408] sm:$0xff] }
 0x4d2   : > { %1715 = vmatpush.bf16.msrb.mxu2 %v2861_v27  ;;  %v2871_v27 = vld [vmem:[#allocation5 + $0x400] sm:$0xff] }
 0x540   : > { %v969_v29 = vpop.f32.mrf.mxu2 }
 0x541   : > { %v970_v30 = vadd.f32 %v2988_v28, %v969_v29  ;;  %v2834_v28 = vld [vmem:[#allocation5 + $0x2d8] sm:$0xff]  ;;  %v2833_v29 = vld [vmem:[#allocation5 + $0x2d0] sm:$0xff] }
 0x542   : > { %1426 = vmatpush.bf16.msra.mxu3 %v2834_v28  ;;  %v2860_v28 = vld [vmem:[#allocation5 + $0x3a8] sm:$0xff] }
 0x543   : > { %v973_v31 = vmax.f32 %v970_v30, 0.0  ;;  %v2993_v30 = vld [vmem:[#allocation7 + $0x9] ss:$0 sm:$0xff]  ;;  %1716 = vmatpush.bf16.msrb.mxu2 %v2860_v28  ;;  %v2886_v28 = vld [vmem:[#allocation5 + $0x478] sm:$0xff] }
 0x545   : > { %v974_v32 = vpack.c.bf16 %v973_v31, %v973_v31 }
 0x546   : > { %1427 = vmatpush.bf16.msra.mxu3 %v2833_v29  ;;  %v2859_v29 = vld [vmem:[#allocation5 + $0x3a0] sm:$0xff] }
 0x547   : > { %1053 = vmatmul.bf16.vlgmr.msrb.gmra.mxu3 %v974_v32  ;;  %1717 = vmatpush.bf16.msrb.mxu2 %v2859_v29  ;;  %v2885_v29 = vld [vmem:[#allocation5 + $0x470] sm:$0xff] }
 0x548   : > { %v971_v33 = vpop.f32.mrf.mxu2 }
 0x5ca   : > { %v1054_v37 = vpop.f32.mrf.mxu3 }
 0x5cb   : > { %v1055_v38 = vadd.f32 %v2989_v36, %v1054_v37  ;;  %v2832_v36 = vld [vmem:[#allocation5 + $0x2c8] sm:$0xff]  ;;  %v2831_v37 = vld [vmem:[#allocation5 + $0x2c0] sm:$0xff] }
 0x5cc   : > { %1428 = vmatpush.bf16.msra.mxu3 %v2832_v36 }
 0x5cd   : > { %v1058_v39 = vmax.f32 %v1055_v38, 0.0  ;;  %v2994_v38 = vld [vmem:[#allocation7 + $0xa] ss:$0 sm:$0xff] }
 0x5cf   : > { %v1059_v40 = vpack.c.bf16 %v1058_v39, %v1058_v39 }
 0x5d0   : > { %1429 = vmatpush.bf16.msra.mxu3 %v2831_v37 }
 0x5d1   : > { %1138 = vmatmul.bf16.vlgmr.msra.gmra.mxu0 %v1059_v40 }
 0x5d2   : > { %v1056_v41 = vpop.f32.mrf.mxu3 }
 0x5d4   : > { %1836 = vmatpush.bf16.msrb.mxu3 %v2870_v54 }
 0x5d8   : > { %1837 = vmatpush.bf16.msrb.mxu3 %v2869_v55 }
 0x64e   : > { %v1139_v43 = vpop.f32.mrf.mxu0 }
 0x64f   : > { %v1140_v44 = vadd.f32 %v2990_v42, %v1139_v43 }
 0x651   : > { %v1143_v45 = vpack.c.bf16 %v1140_v44, %v1140_v44  ;;  %v2995_v44 = vld [vmem:[#allocation7 + $0xb] ss:$0 sm:$0xff] }
 0x653   : > { %v1144_v46 = vunpack.c.l.bf16 %v1143_v45 }
 0x655   : > { %v1145_v47 = vadd.f32 %v1144_v46, %v888_v18  ;;  %v2992_v18 = vld [vmem:[#allocation10 + $0x2] ss:$0 sm:$0xff] }
 0x656   : > { %v1141_v48 = vpop.f32.mrf.mxu0 }
 0x657   : > { %1146 = vadd.xlane.f32.xlu2 %v1145_v47  ;;  %v1148_v49 = vmul.f32 %v1145_v47, %v1145_v47 }
 0x65f   : > { %1149 = vadd.xlane.f32.xlu2 %v1148_v49 }
 0x6ca   : > { %v1147_v56 = vpop.xlane.xlu2 %1146 }
 0x6cb   : > { %v1151_v59 = vmul.f32 0.0078125, %v1147_v56  ;;  %v2842_v56 = vld [vmem:[#allocation5 + $0x318] sm:$0xff] }
 0x6cc   : > { %1548 = vmatpush.bf16.msrb.mxu0 %v2842_v56  ;;  %v2868_v56 = vld [vmem:[#allocation5 + $0x3e8] sm:$0xff] }
 0x6cd   : > { %v1153_v61 = vmul.f32 %v1151_v59, %v1151_v59  ;;  %v1167_v14 = vsub.f32 %v1145_v47, %v1151_v59  ;;  %v2839_v59 = vld [vmem:[#allocation5 + $0x300] sm:$0xff]  ;;  %1838 = vmatpush.bf16.msrb.mxu3 %v2868_v56 }
 0x6d0   : > { %1549 = vmatpush.bf16.msrb.mxu0 %v2841_v57  ;;  %v2867_v57 = vld [vmem:[#allocation5 + $0x3e0] sm:$0xff] }
 0x6d1   : > { %1839 = vmatpush.bf16.msrb.mxu3 %v2867_v57 }
 0x6d2   : > { %v1150_v60 = vpop.xlane.xlu2 %1149 }
 0x6d3   : > { %v1152_v62 = vmul.f32 0.0078125, %v1150_v60 }
 0x6d4   : > { %1550 = vmatpush.bf16.msrb.mxu0 %v2840_v58  ;;  %v2866_v58 = vld [vmem:[#allocation5 + $0x3d8] sm:$0xff] }
 0x6d5   : > { %v1154_v63 = vsub.f32 %v1152_v62, %v1153_v61  ;;  %1840 = vmatpush.bf16.msrb.mxu3 %v2866_v58 }
 0x6d7   : > { %v1155_v1 = vmax.f32 %v1154_v63, 0.0 }
 0x6d8   : > { %1551 = vmatpush.bf16.msrb.mxu0 %v2839_v59  ;;  %v2865_v59 = vld [vmem:[#allocation5 + $0x3d0] sm:$0xff] }
 0x6d9   : > { %v1156_v3 = vadd.f32 1e-05, %v1155_v1  ;;  %1841 = vmatpush.bf16.msrb.mxu3 %v2865_v59 }
 0x6db   : > { %3010 = vrsqrt.f32 %v1156_v3  ;;  %vm1163_vm7 = vweird.f32 %v1156_v3 }
 0x6dc   : > { %1921 = vmatpush.bf16.msra.mxu0 %v2878_v4 }
 0x6e1   : > { %v3011_v6 = vpop.eup %3010 }
 0x6e2   : > { %v1158_v7 = vmul.f32 %v3011_v6, %v1156_v3  ;;  %vm1164_vm6 = vweird.f32 %v3011_v6 }
 0x6e3   : > { %vm1165_vm8 = vmor %vm1163_vm7, %vm1164_vm6 }
 0x6e4   : > { %v1159_v9 = vmul.f32 %v3011_v6, %v1158_v7  ;;  %v2851_v7 = vld [vmem:[#allocation5 + $0x360] sm:$0xff] }
 0x6e6   : > { %v1160_v10 = vmul.f32 0.5, %v1159_v9 }
 0x6e8   : > { %v1161_v12 = vsub.f32 1.5, %v1160_v10  ;;  %v2850_v10 = vld [vmem:[#allocation5 + $0x358] sm:$0xff] }
 0x6ea   : > { %v1162_v13 = vmul.f32 %v3011_v6, %v1161_v12 }
 0x6ec   : > { %v1166_v16 = vsel %vm1165_vm8, %v3011_v6, %v1162_v13  ;;  %v2852_v6 = vld [vmem:[#allocation5 + $0x368] sm:$0xff]  ;;  %v2849_v13 = vld [vmem:[#allocation5 + $0x350] sm:$0xff] }
 0x6ed   : > { %v1168_v17 = vmul.f32 %v1167_v14, %v1166_v16  ;;  %1631 = vmatpush.bf16.msrb.mxu1 %v2852_v6  ;;  %v2877_v6 = vld [vmem:[#allocation5 + $0x430] sm:$0xff] }
 0x6ee   : > { %1922 = vmatpush.bf16.msra.mxu0 %v2877_v6 }
 0x6ef   : > { %v1174_v19 = vmul.f32 %v2991_v15, %v1168_v17  ;;  %v2996_v17 = vld [vmem:[#allocation8 + $0x3] ss:$0 sm:$0xff] }
 0x6f1   : > { %v1180_v20 = vadd.f32 %v2992_v18, %v1174_v19  ;;  %1632 = vmatpush.bf16.msrb.mxu1 %v2851_v7 }
 0x6f3   : > { %v1181_v21 = vpack.c.bf16 %v1180_v20, %v1180_v20 }
 0x6f5   : > { %1260 = vmatmul.bf16.vlgmr.msra.gmra.mxu1 %v1181_v21 }
 0x6f6   : > { %1633 = vmatpush.bf16.msrb.mxu1 %v2850_v10 }
 0x6fa   : > { %1634 = vmatpush.bf16.msrb.mxu1 %v2849_v13 }
 0x6fe   : > { %1635 = vmatpush.bf16.msrb.mxu1 %v2848_v24 }
 0x702   : > { %1636 = vmatpush.bf16.msrb.mxu1 %v2847_v25 }
 0x706   : > { %2006 = vmatpush.bf16.msra.mxu1 %v2886_v28 }
 0x70a   : > { %2007 = vmatpush.bf16.msra.mxu1 %v2885_v29 }
 0x772   : > { %v1261_v31 = vpop.f32.mrf.mxu1 }
 0x773   : > { %v1262_v32 = vadd.f32 %v2993_v30, %v1261_v31  ;;  %v2858_v30 = vld [vmem:[#allocation5 + $0x398] sm:$0xff]  ;;  %v2857_v31 = vld [vmem:[#allocation5 + $0x390] sm:$0xff] }
 0x774   : > { %1718 = vmatpush.bf16.msrb.mxu2 %v2858_v30  ;;  %v2884_v30 = vld [vmem:[#allocation5 + $0x468] sm:$0xff] }
 0x775   : > { %v1265_v33 = vmax.f32 %v1262_v32, 0.0  ;;  %v2998_v32 = vld [vmem:[#allocation7 + $0xc] ss:$0 sm:$0xff]  ;;  %2008 = vmatpush.bf16.msra.mxu1 %v2884_v30 }
 0x777   : > { %v1266_v34 = vpack.c.bf16 %v1265_v33, %v1265_v33 }
 0x778   : > { %1719 = vmatpush.bf16.msrb.mxu2 %v2857_v31  ;;  %v2883_v31 = vld [vmem:[#allocation5 + $0x460] sm:$0xff] }
 0x779   : > { %1345 = vmatmul.bf16.vlgmr.msra.gmra.mxu2 %v1266_v34  ;;  %2009 = vmatpush.bf16.msra.mxu1 %v2883_v31 }
 0x77a   : > { %v1263_v35 = vpop.f32.mrf.mxu1 }
 0x7fc   : > { %v1346_v39 = vpop.f32.mrf.mxu2 }
 0x7fd   : > { %v1347_v40 = vadd.f32 %v2994_v38, %v1346_v39  ;;  %v2856_v38 = vld [vmem:[#allocation5 + $0x388] sm:$0xff]  ;;  %v2855_v39 = vld [vmem:[#allocation5 + $0x380] sm:$0xff] }
 0x7fe   : > { %1720 = vmatpush.bf16.msrb.mxu2 %v2856_v38 }
 0x7ff   : > { %v1350_v41 = vmax.f32 %v1347_v40, 0.0  ;;  %v2999_v40 = vld [vmem:[#allocation7 + $0xd] ss:$0 sm:$0xff] }
 0x801   : > { %v1351_v42 = vpack.c.bf16 %v1350_v41, %v1350_v41 }
 0x802   : > { %1721 = vmatpush.bf16.msrb.mxu2 %v2855_v39 }
 0x803   : > { %1430 = vmatmul.bf16.vlgmr.msra.gmra.mxu3 %v1351_v42 }
 0x804   : > { %v1348_v43 = vpop.f32.mrf.mxu2 }
 0x886   : > { %v1431_v45 = vpop.f32.mrf.mxu3 }
 0x887   : > { %v1432_v46 = vadd.f32 %v2995_v44, %v1431_v45 }
 0x889   : > { %v1435_v47 = vpack.c.bf16 %v1432_v46, %v1432_v46  ;;  %v3000_v46 = vld [vmem:[#allocation7 + $0xe] ss:$0 sm:$0xff] }
 0x88b   : > { %v1436_v48 = vunpack.c.l.bf16 %v1435_v47 }
 0x88d   : > { %v1437_v49 = vadd.f32 %v1436_v48, %v1180_v20  ;;  %v2997_v20 = vld [vmem:[#allocation10 + $0x3] ss:$0 sm:$0xff] }
 0x88e   : > { %v1433_v50 = vpop.f32.mrf.mxu3 }
 0x88f   : > { %1438 = vadd.xlane.f32.xlu0 %v1437_v49  ;;  %v1440_v51 = vmul.f32 %v1437_v49, %v1437_v49 }
 0x891   : > { %1441 = vadd.xlane.f32.xlu1 %v1440_v51 }
 0x902   : > { %v1439_v60 = vpop.xlane.xlu0 %1438 }
 0x903   : > { %v1443_v61 = vmul.f32 0.0078125, %v1439_v60  ;;  %v2864_v60 = vld [vmem:[#allocation5 + $0x3c8] sm:$0xff] }
 0x904   : > { %v1442_v62 = vpop.xlane.xlu1 %1441  ;;  %1842 = vmatpush.bf16.msrb.mxu3 %v2864_v60 }
 0x905   : > { %v1445_v63 = vmul.f32 %v1443_v61, %v1443_v61  ;;  %v1444_v0 = vmul.f32 0.0078125, %v1442_v62  ;;  %v1459_v16 = vsub.f32 %v1437_v49, %v1443_v61  ;;  %v2863_v61 = vld [vmem:[#allocation5 + $0x3c0] sm:$0xff] }
 0x907   : > { %v1446_v1 = vsub.f32 %v1444_v0, %v1445_v63 }
 0x908   : > { %1843 = vmatpush.bf16.msrb.mxu3 %v2863_v61 }
 0x909   : > { %v1447_v3 = vmax.f32 %v1446_v1, 0.0 }
 0x90b   : > { %v1448_v5 = vadd.f32 1e-05, %v1447_v3 }
 0x90d   : > { %3012 = vrsqrt.f32 %v1448_v5  ;;  %vm1455_vm10 = vweird.f32 %v1448_v5 }
 0x913   : > { %v3013_v8 = vpop.eup %3012 }
 0x914   : > { %v1450_v9 = vmul.f32 %v3013_v8, %v1448_v5  ;;  %vm1456_vm9 = vweird.f32 %v3013_v8 }
 0x915   : > { %vm1457_vm11 = vmor %vm1455_vm10, %vm1456_vm9 }
 0x916   : > { %v1451_v11 = vmul.f32 %v3013_v8, %v1450_v9  ;;  %v2875_v9 = vld [vmem:[#allocation5 + $0x420] sm:$0xff] }
 0x918   : > { %v1452_v12 = vmul.f32 0.5, %v1451_v11 }
 0x91a   : > { %v1453_v14 = vsub.f32 1.5, %v1452_v12  ;;  %v2874_v12 = vld [vmem:[#allocation5 + $0x418] sm:$0xff] }
 0x91c   : > { %v1454_v15 = vmul.f32 %v3013_v8, %v1453_v14 }
 0x91e   : > { %v1458_v18 = vsel %vm1457_vm11, %v3013_v8, %v1454_v15  ;;  %v2876_v8 = vld [vmem:[#allocation5 + $0x428] sm:$0xff]  ;;  %v2873_v15 = vld [vmem:[#allocation5 + $0x410] sm:$0xff] }
 0x91f   : > { %v1460_v19 = vmul.f32 %v1459_v16, %v1458_v18  ;;  %1923 = vmatpush.bf16.msra.mxu0 %v2876_v8 }
 0x921   : > { %v1466_v21 = vmul.f32 %v2996_v17, %v1460_v19  ;;  %v3001_v19 = vld [vmem:[#allocation8 + $0x4] ss:$0 sm:$0xff] }
 0x923   : > { %v1472_v22 = vadd.f32 %v2997_v20, %v1466_v21  ;;  %1924 = vmatpush.bf16.msra.mxu0 %v2875_v9 }
 0x925   : > { %v1473_v23 = vpack.c.bf16 %v1472_v22, %v1472_v22 }
 0x927   : > { %1552 = vmatmul.bf16.vlgmr.msrb.gmra.mxu0 %v1473_v23 }
 0x928   : > { %1925 = vmatpush.bf16.msra.mxu0 %v2874_v12 }
 0x92c   : > { %1926 = vmatpush.bf16.msra.mxu0 %v2873_v15 }
 0x930   : > { %1927 = vmatpush.bf16.msra.mxu0 %v2872_v26 }
 0x934   : > { %1928 = vmatpush.bf16.msra.mxu0 %v2871_v27 }
 0x9a4   : > { %v1553_v33 = vpop.f32.mrf.mxu0 }
 0x9a5   : > { %v1554_v34 = vadd.f32 %v2998_v32, %v1553_v33  ;;  %v2882_v32 = vld [vmem:[#allocation5 + $0x458] sm:$0xff]  ;;  %v2881_v33 = vld [vmem:[#allocation5 + $0x450] sm:$0xff] }
 0x9a6   : > { %2010 = vmatpush.bf16.msra.mxu1 %v2882_v32 }
 0x9a7   : > { %v1557_v35 = vmax.f32 %v1554_v34, 0.0  ;;  %v3003_v34 = vld [vmem:[#allocation7 + $0xf] ss:$0 sm:$0xff] }
 0x9a9   : > { %v1558_v36 = vpack.c.bf16 %v1557_v35, %v1557_v35 }
 0x9aa   : > { %2011 = vmatpush.bf16.msra.mxu1 %v2881_v33 }
 0x9ab   : > { %1637 = vmatmul.bf16.vlgmr.msrb.gmra.mxu1 %v1558_v36 }
 0x9ac   : > { %v1555_v37 = vpop.f32.mrf.mxu0 }
 0xa28   : > { %v1638_v41 = vpop.f32.mrf.mxu1 }
 0xa29   : > { %v1639_v42 = vadd.f32 %v2999_v40, %v1638_v41  ;;  %v2880_v40 = vld [vmem:[#allocation5 + $0x448] sm:$0xff]  ;;  %v2879_v41 = vld [vmem:[#allocation5 + $0x440] sm:$0xff] }
 0xa2a   : > { %2012 = vmatpush.bf16.msra.mxu1 %v2880_v40 }
 0xa2b   : > { %v1642_v43 = vmax.f32 %v1639_v42, 0.0  ;;  %v3004_v42 = vld [vmem:[#allocation7 + $0x10] ss:$0 sm:$0xff] }
 0xa2d   : > { %v1643_v44 = vpack.c.bf16 %v1642_v43, %v1642_v43 }
 0xa2e   : > { %2013 = vmatpush.bf16.msra.mxu1 %v2879_v41 }
 0xa2f   : > { %1722 = vmatmul.bf16.vlgmr.msrb.gmra.mxu2 %v1643_v44 }
 0xa30   : > { %v1640_v45 = vpop.f32.mrf.mxu1 }
 0xab2   : > { %v1723_v47 = vpop.f32.mrf.mxu2 }
 0xab3   : > { %v1724_v48 = vadd.f32 %v3000_v46, %v1723_v47 }
 0xab5   : > { %v1727_v49 = vpack.c.bf16 %v1724_v48, %v1724_v48  ;;  %v3005_v48 = vld [vmem:[#allocation7 + $0x11] ss:$0 sm:$0xff] }
 0xab7   : > { %v1728_v50 = vunpack.c.l.bf16 %v1727_v49 }
 0xab9   : > { %v1729_v51 = vadd.f32 %v1728_v50, %v1472_v22  ;;  %v3002_v22 = vld [vmem:[#allocation10 + $0x4] ss:$0 sm:$0xff] }
 0xaba   : > { %v1725_v52 = vpop.f32.mrf.mxu2 }
 0xabb   : > { %1730 = vadd.xlane.f32.xlu2 %v1729_v51  ;;  %v1732_v53 = vmul.f32 %v1729_v51, %v1729_v51 }
 0xabd   : > { %1733 = vadd.xlane.f32.xlu0 %v1732_v53 }
 0xb2e   : > { %v1731_v62 = vpop.xlane.xlu2 %1730 }
 0xb2f   : > { %v1735_v63 = vmul.f32 0.0078125, %v1731_v62 }
 0xb30   : > { %v1734_v0 = vpop.xlane.xlu0 %1733 }
 0xb31   : > { %v1737_v1 = vmul.f32 %v1735_v63, %v1735_v63  ;;  %v1736_v2 = vmul.f32 0.0078125, %v1734_v0  ;;  %v1751_v18 = vsub.f32 %v1729_v51, %v1735_v63 }
 0xb33   : > { %v1738_v3 = vsub.f32 %v1736_v2, %v1737_v1 }
 0xb35   : > { %v1739_v5 = vmax.f32 %v1738_v3, 0.0 }
 0xb37   : > { %v1740_v7 = vadd.f32 1e-05, %v1739_v5 }
 0xb39   : > { %3014 = vrsqrt.f32 %v1740_v7  ;;  %vm1747_vm13 = vweird.f32 %v1740_v7 }
 0xb3f   : > { %v3015_v10 = vpop.eup %3014 }
 0xb40   : > { %v1742_v11 = vmul.f32 %v3015_v10, %v1740_v7  ;;  %vm1748_vm12 = vweird.f32 %v3015_v10 }
 0xb41   : > { %vm1749_vm14 = vmor %vm1747_vm13, %vm1748_vm12 }
 0xb42   : > { %v1743_v13 = vmul.f32 %v3015_v10, %v1742_v11 }
 0xb44   : > { %v1744_v14 = vmul.f32 0.5, %v1743_v13 }
 0xb46   : > { %v1745_v16 = vsub.f32 1.5, %v1744_v14 }
 0xb48   : > { %v1746_v17 = vmul.f32 %v3015_v10, %v1745_v16 }
 0xb4a   : > { %v1750_v20 = vsel %vm1749_vm14, %v3015_v10, %v1746_v17 }
 0xb4b   : > { %v1752_v21 = vmul.f32 %v1751_v18, %v1750_v20 }
 0xb4d   : > { %v1758_v23 = vmul.f32 %v3001_v19, %v1752_v21 }
 0xb4f   : > { %v1764_v24 = vadd.f32 %v3002_v22, %v1758_v23 }
 0xb51   : > { %v1765_v25 = vpack.c.bf16 %v1764_v24, %v1764_v24 }
 0xb53   : > { %1844 = vmatmul.bf16.vlgmr.msrb.gmra.mxu3 %v1765_v25 }
 0xbd6   : > { %v1845_v35 = vpop.f32.mrf.mxu3 }
 0xbd7   : > { %v1846_v36 = vadd.f32 %v3003_v34, %v1845_v35 }
 0xbd9   : > { %v1849_v37 = vmax.f32 %v1846_v36, 0.0 }
 0xbdb   : > { %v1850_v38 = vpack.c.bf16 %v1849_v37, %v1849_v37 }
 0xbdd   : > { %1929 = vmatmul.bf16.vlgmr.msra.gmra.mxu0 %v1850_v38 }
 0xbde   : > { %v1847_v39 = vpop.f32.mrf.mxu3 }
 0xc5a   : > { %v1930_v43 = vpop.f32.mrf.mxu0 }
 0xc5b   : > { %v1931_v44 = vadd.f32 %v3004_v42, %v1930_v43 }
 0xc5d   : > { %v1934_v45 = vmax.f32 %v1931_v44, 0.0 }
 0xc5f   : > { %v1935_v46 = vpack.c.bf16 %v1934_v45, %v1934_v45 }
 0xc61   : > { %2014 = vmatmul.bf16.vlgmr.msra.gmra.mxu1 %v1935_v46 }
 0xc62   : > { %v1932_v47 = vpop.f32.mrf.mxu0 }
 0xcde   : > { %v2015_v49 = vpop.f32.mrf.mxu1 }
 0xcdf   : > { %v2016_v50 = vadd.f32 %v3005_v48, %v2015_v49 }
 0xce1   : > { %v2019_v51 = vpack.c.bf16 %v2016_v50, %v2016_v50 }
 0xce3   : > { %v2020_v52 = vunpack.c.l.bf16 %v2019_v51 }
 0xce5   : > { %v2021_v53 = vadd.f32 %v2020_v52, %v1764_v24 }
 0xce6   : > { %v2017_v54 = vpop.f32.mrf.mxu1 }
 0xce7   : > { %2022 = vst [vmem:[%s307_s30] sm:$0xff] %v2021_v53 }
 0xce8   : > { %3193 = shalt.err (!%p3190_p9)
}
 0xce9   : > { %2905 = dma.vmem_to_hbm [thread:$0]  (%p3367_p4), %s2037_s6, 128, %s2039_s9, %s2024_s15  }
 0xcea PF: > { %s2050_s12 = sand.u32 1, %s3228_s18   ;;  %p3467_p10 = scmp.ge.s32.totalorder %s3240_s21, 2 }
 0xceb   : > { %s2051_s8 = scalar_lea.sflag [#allocation4], %s2050_s12 }
 0xcec   : > { %p2925_p13 = pnand %p3467_p10, %p3371_p6 }
 0xcee   : > { %p2926_p11 = pneg %p2925_p13 }
 0xcf0   : > { %3223 = dma.done.wait (%p2926_p11), %s2051_s8, 128  }
 0xcf1   : > { %3225 = vsyncadd (%p2926_p11), %s2051_s8, 4294967168  ;;  %p20_p0 = scmp.ge.s32.totalorder %s3341_s7, 4   ;;  %s3468_s18 = smov %s3232_s19 }
 0xcf2   : > { %s3469_s19 = smov %s3236_s20  ;;  %s3470_s20 = smov %s3352_s10 }
 0xcf3   : > { %s3471_s21 = smov %s3341_s7  ;;  %22 = sbr.rel (!%p20_p0) target bundleno = 7 (0x7), region = 143 }
 0xcf8   :  { %2057 = vsyncpa [#allocation3], 1 }
 0xcf9   :  { %2059 = vsyncpa [#allocation3 + $0x1], 1 }
 0xcfa   :  { %2060 = vsyncpa [#allocation6], 1 }
 0xcfb   :  { %2061 = vsyncpa [#allocation9], 1 }
 0xcfc   :  { %2062 = vsyncpa [#allocation4], 1 }
 0xcfd   :  { %2064 = vsyncpa [#allocation4 + $0x1], 1 }

</bundles_post_ra>
